<compile_context>
chip_gen: v7x
topology: tpu7x:2x2x1
jax: 0.10.0
libtpu: 0.0.40
codegen_flags: <defaults>
</compile_context>

<pallas_src>
import functools

import jax
import jax.numpy as jnp
from jax import lax
from jax.experimental import pallas as pl
from jax.experimental.pallas import tpu as pltpu


def _round_up(x: int, m: int) -> int:
    return ((x + m - 1) // m) * m


def _mixer_attention_body(q_ref, k_ref, v_ref, dmat_ref, mask_ref,
                          w1_ref, b1_ref, w2_ref, o_ref,
                          *, num_scores: int, hidden_dim: int, row_chunk: int):
    # Grid point (b, mt, h):
    #   q_ref   : (TM, D)         this head's query tile
    #   k_ref   : (H, D, N)       all heads, lane-dense on N, resident per batch
    #   v_ref   : (H, N, DV)      all heads, resident per batch
    #   dmat_ref: (S, TM, N)      lane-dense dmat planes, resident across heads
    #   mask_ref: (TM, N) | None  additive mask, resident across heads
    #   w1_ref  : (H, (S+1)*HID)  SMEM (scores row pre-scaled by 1/sqrt(D))
    #   b1_ref  : (H, HID)        SMEM
    #   w2_ref  : (H, HID)        SMEM
    #   o_ref   : (H, TM, DV)     resident across heads; written back per (b, mt)
    h = pl.program_id(2)
    tm = q_ref.shape[0]
    ch = row_chunk
    n_chunks = tm // ch

    small_hid = hidden_dim <= 32
    if small_hid:
        # Hoist the per-head mixer scalars (SMEM reads) out of the chunk loop.
        w1_sc = [w1_ref[h, c] for c in range(hidden_dim)]
        w1_dm = [[w1_ref[h, (s + 1) * hidden_dim + c] for c in range(hidden_dim)]
                 for s in range(num_scores)]
        b1_s = [b1_ref[h, c] for c in range(hidden_dim)]
        w2_s = [w2_ref[h, c] for c in range(hidden_dim)]

    def mix(scores_c, dmat_cs):
        # 2-layer mixer MLP accumulated channel-by-channel; all operands are
        # (CH, N) chunks that stay in vregs for the whole HID loop.
        if small_hid:
            mixed = jnp.zeros_like(scores_c)
            for c in range(hidden_dim):
                a = scores_c * w1_sc[c]
                for s in range(num_scores):
                    a = a + dmat_cs[s] * w1_dm[s][c]
                a = jnp.maximum(a + b1_s[c], 0.0)
                mixed = mixed + a * w2_s[c]
            return mixed

        # Large hidden_dim: bounded code size via fori_loop + dynamic SMEM reads.
        def chan(c, acc):
            a = scores_c * w1_ref[h, c]
            for s in range(num_scores):
                a = a + dmat_cs[s] * w1_ref[h, (s + 1) * hidden_dim + c]
            a = jnp.maximum(a + b1_ref[h, c], 0.0)
            return acc + a * w2_ref[h, c]
        return lax.fori_loop(0, hidden_dim, chan, jnp.zeros_like(scores_c))

    def process_chunk(r0):
        # scores = q @ k^T (1/sqrt(D) already folded into W1's scores row).
        q_c = q_ref[pl.ds(r0, ch), :]
        scores_c = jnp.dot(q_c, k_ref[h], preferred_element_type=jnp.float32)
        dmat_cs = [dmat_ref[s, pl.ds(r0, ch), :] for s in range(num_scores)]

        mixed = mix(scores_c, dmat_cs)
        # NOTE: mix_b2 (per-head additive constant) is intentionally dropped:
        # softmax is shift-invariant, so the result is numerically identical.
        if mask_ref is not None:
            mixed = mixed + mask_ref[pl.ds(r0, ch), :]

        # Softmax over keys (full N is present in every chunk).
        mixed = mixed - jnp.max(mixed, axis=-1, keepdims=True)
        e = jnp.exp(mixed)
        denom = jnp.sum(e, axis=-1, keepdims=True)
        attn = e * pl.reciprocal(denom, approx=False)   # exact: keeps 1e-5 tol

        out_c = jnp.dot(attn.astype(v_ref.dtype), v_ref[h],
                        preferred_element_type=jnp.float32)
        o_ref[h, pl.ds(r0, ch), :] = out_c.astype(o_ref.dtype)

    if n_chunks == 1:
        process_chunk(0)
    else:
        def body(ci, carry):
            process_chunk(pl.multiple_of(ci * ch, ch))
            return carry
        lax.fori_loop(0, n_chunks, body, 0, unroll=False)


def _kernel_no_mask(q_ref, k_ref, v_ref, dmat_ref,
                    w1_ref, b1_ref, w2_ref, o_ref,
                    *, num_scores, hidden_dim, row_chunk):
    _mixer_attention_body(q_ref, k_ref, v_ref, dmat_ref, None,
                          w1_ref, b1_ref, w2_ref, o_ref,
                          num_scores=num_scores, hidden_dim=hidden_dim,
                          row_chunk=row_chunk)


def _kernel_with_mask(q_ref, k_ref, v_ref, dmat_ref, mask_ref,
                      w1_ref, b1_ref, w2_ref, o_ref,
                      *, num_scores, hidden_dim, row_chunk):
    _mixer_attention_body(q_ref, k_ref, v_ref, dmat_ref, mask_ref,
                          w1_ref, b1_ref, w2_ref, o_ref,
                          num_scores=num_scores, hidden_dim=hidden_dim,
                          row_chunk=row_chunk)


def _vmem_limit_bytes() -> int:
    """Scoped-VMEM limit derived from the actual chip, with headroom."""
    try:
        cap = int(getattr(pltpu.get_tpu_info(), "vmem_capacity_bytes", 0) or 0)
    except Exception:
        cap = 0
    if cap <= 0:
        cap = 64 * 1024 * 1024        # assume the smallest per-core VMEM (v7x)
    # ~25% headroom for compiler/internal scratch; cap at 96 MiB on big-VMEM gens.
    return max(16 * 1024 * 1024, min((cap // 4) * 3, 96 * 1024 * 1024))


def _pick_query_tile(m_padded, *, n, d, dv, s, h, has_mask, vmem_limit) -> int:
    """Largest query tile (multiple of 8, <=256) whose per-step VMEM residents
    fit in ~half the scoped limit (rest: live vregs, pipeline, compiler scratch).
    Accounts for (8,128)-tile padding and double buffering."""
    lane = lambda x: _round_up(x, 128)
    sub = lambda x: _round_up(x, 8)
    # TM-independent residents: K/V blocks cover all heads (f32 worst case).
    fixed = 2 * 4 * h * (sub(d) * lane(n) + sub(n) * lane(dv))
    # Per query row: q tile, dmat planes, optional mask, all-head output slab.
    per_row = 2 * 4 * (lane(d) + s * lane(n)
                       + (lane(n) if has_mask else 0) + h * lane(dv))
    budget = vmem_limit // 2 - fixed
    tm_max = budget // per_row if budget > 0 else 8
    tm_max = int(max(8, min(tm_max, 256, m_padded)))
    tm_max -= tm_max % 8
    tm_max = max(tm_max, 8)
    if m_padded <= tm_max:
        return m_padded
    for t in range(tm_max, 7, -8):
        if m_padded % t == 0:
            return t
    return 8


def mixed_scores_sdpa(q, k, v, dmat, mix_W1, mix_b1, mix_W2, mix_b2,
                      attn_mask=None, num_scores=1):
    """Pallas implementation of MixedScoresSDPA.forward (dropout_p = 0)."""
    B, H, M, D = q.shape
    N = k.shape[2]
    DV = v.shape[3]
    HID = mix_W1.shape[-1]
    S = num_scores
    out_dtype = v.dtype

    # K -> (B, H, D, N): contraction dim leading, N lane-dense (no padding, no
    # in-kernel transpose).  q/k/v keep their input dtype for the MXU.
    k_t = jnp.swapaxes(k, -1, -2)

    # dmat -> (B, S, M, N): every plane lane-dense on N; mixer math in f32.
    dmat = dmat.reshape(B, M, N, S)
    dmat = jnp.transpose(dmat, (0, 3, 1, 2)).astype(jnp.float32)

    # Mixer params -> SMEM-friendly 2-D f32.  Fold 1/sqrt(D) into W1's scores
    # row; mix_b2 is dropped on purpose: softmax(x + c) == softmax(x).
    scale = jnp.float32(1.0 / (D ** 0.5))
    w1 = mix_W1.astype(jnp.float32)
    w1 = w1.at[:, 0, :].multiply(scale)
    w1_2d = w1.reshape(H, (S + 1) * HID)
    b1_2d = mix_b1.reshape(H, HID).astype(jnp.float32)
    w2_2d = mix_W2.reshape(H, HID).astype(jnp.float32)
    # mix_b2 intentionally unused (see note above).

    # Additive mask (only built / DMA'd when a mask is actually supplied).
    # Matches PyTorch: boolean rows with no valid key are forced all-valid.
    if attn_mask is None:
        add_mask = None
    elif attn_mask.dtype == jnp.bool_:
        msk = attn_mask
        if msk.ndim == 2:
            msk = msk[None]
        msk = jnp.broadcast_to(msk, (B, M, N))
        any_valid = jnp.any(msk, axis=-1, keepdims=True)
        msk = jnp.where(any_valid, msk, True)
        add_mask = jnp.where(msk, 0.0, -jnp.inf).astype(jnp.float32)
    else:
        add_mask = jnp.broadcast_to(attn_mask, (B, M, N)).astype(jnp.float32)

    # Pad the query dim to a sublane multiple so it can always be tiled.
    M_p = _round_up(M, 8)
    if M_p != M:
        pad = M_p - M
        q = jnp.pad(q, ((0, 0), (0, 0), (0, pad), (0, 0)))
        dmat = jnp.pad(dmat, ((0, 0), (0, 0), (0, pad), (0, 0)))
        if add_mask is not None:
            add_mask = jnp.pad(add_mask, ((0, 0), (0, pad), (0, 0)))

    vmem_limit = _vmem_limit_bytes()
    TM = _pick_query_tile(M_p, n=N, d=D, dv=DV, s=S, h=H,
                          has_mask=add_mask is not None, vmem_limit=vmem_limit)
    MT = M_p // TM
    CH = 8 if TM % 8 == 0 else TM
    grid = (B, MT, H)   # H innermost: K/V/dmat/mask/out blocks resident across heads

    smem = pl.BlockSpec(memory_space=pltpu.MemorySpace.SMEM)
    in_specs = [
        pl.BlockSpec((None, None, TM, D), lambda b, mt, h: (b, h, mt, 0)),  # q
        pl.BlockSpec((None, H, D, N), lambda b, mt, h: (b, 0, 0, 0)),       # k (all heads, per-batch)
        pl.BlockSpec((None, H, N, DV), lambda b, mt, h: (b, 0, 0, 0)),      # v (all heads, per-batch)
        pl.BlockSpec((None, S, TM, N), lambda b, mt, h: (b, 0, mt, 0)),     # dmat
    ]
    args = [q, k_t, v, dmat]
    if add_mask is not None:
        in_specs.append(pl.BlockSpec((None, TM, N), lambda b, mt, h: (b, mt, 0)))
        args.append(add_mask)
    in_specs += [smem, smem, smem]
    args += [w1_2d, b1_2d, w2_2d]

    kernel_fn = _kernel_with_mask if add_mask is not None else _kernel_no_mask
    kernel = functools.partial(kernel_fn, num_scores=S, hidden_dim=HID,
                               row_chunk=CH)

    # Advisory cost estimate (K/V counted once per batch: they are resident).
    mixer_flops = HID * (2 * (S + 1) + 2) + 6
    flops = B * H * M_p * N * (2 * D + 2 * DV + mixer_flops)
    bytes_accessed = 4 * (B * H * M_p * D
                          + B * H * D * N
                          + B * H * N * DV
                          + B * S * M_p * N
                          + (B * M_p * N if add_mask is not None else 0)
                          + B * H * M_p * DV)
    cost = pl.CostEstimate(flops=int(flops),
                           transcendentals=int(B * H * M_p * N),
                           bytes_accessed=int(bytes_accessed))

    # TODO(synk): on v7x, consider pltpu.CORE_PARALLEL on the batch axis (or an
    #   explicit core_map split) to guarantee both TensorCores are used.
    # TODO(synk): for very large N, add a key-axis grid dim with online softmax
    #   so VMEM usage becomes O(TM*TN) instead of O(TM*N).
    out = pl.pallas_call(
        kernel,
        out_shape=jax.ShapeDtypeStruct((B, H, M_p, DV), out_dtype),
        grid=grid,
        in_specs=in_specs,
        out_specs=pl.BlockSpec((None, H, TM, DV), lambda b, mt, h: (b, 0, mt, 0)),
        compiler_params=pltpu.CompilerParams(
            dimension_semantics=("parallel", "parallel", "arbitrary"),
            vmem_limit_bytes=vmem_limit),
        cost_estimate=cost,
    )(*args)

    if M_p != M:
        out = out[:, :, :M, :]
    return out


def _reference(q, k, v, dmat, mix_W1, mix_b1, mix_W2, mix_b2, num_scores=1):
    """Pure-JAX reference mirroring the PyTorch forward (attn_mask=None)."""
    B, H, M, D = q.shape
    N = k.shape[2]
    dmat = dmat.reshape(B, M, N, num_scores)
    scores = jnp.einsum("bhmd,bhnd->bhmn", q, k) / (k.shape[-1] ** 0.5)
    feat = jnp.concatenate(
        [scores[..., None],
         jnp.broadcast_to(dmat[:, None], (B, H, M, N, num_scores))], axis=-1)
    feat = jnp.transpose(feat, (0, 2, 1, 3, 4))                   # (B,M,H,N,S+1)
    hid = jax.nn.relu(jnp.einsum("bmhns,hst->bmhnt", feat, mix_W1)
                      + mix_b1[None, None, :, None, :])
    mixed = (jnp.einsum("bmhnt,hto->bmhno", hid, mix_W2)
             + mix_b2[None, None, :, None, :])
    mixed = jnp.transpose(mixed, (0, 2, 1, 3, 4))[..., 0]         # (B,H,M,N)
    w = jax.nn.softmax(mixed, axis=-1)
    return jnp.einsum("bhmn,bhnd->bhmd", w, v)


if __name__ == "__main__":
    # M=12 is deliberately not a multiple of 8: exercises query padding and the
    # in-kernel row-chunk loop (two 8-row chunks after padding to 16).
    B, H, M, N, D, DV = 2, 4, 12, 8, 16, 16
    NUM_SCORES, HID = 1, 16
    mix1_init = (1 / 2) ** 0.5
    mix2_init = (1 / 16) ** 0.5

    key = jax.random.PRNGKey(0)
    kq, kk, kv, kd, kw1, kb1, kw2, kb2 = jax.random.split(key, 8)

    q = jax.random.normal(kq, (B, H, M, D), jnp.float32)
    k = jax.random.normal(kk, (B, H, N, D), jnp.float32)
    v = jax.random.normal(kv, (B, H, N, DV), jnp.float32)
    dmat = jax.random.normal(kd, (B, M, N), jnp.float32)

    mix_W1 = jax.random.uniform(kw1, (H, NUM_SCORES + 1, HID), jnp.float32,
                                -mix1_init, mix1_init)
    mix_b1 = jax.random.uniform(kb1, (H, HID), jnp.float32,
                                -mix1_init, mix1_init)
    mix_W2 = jax.random.uniform(kw2, (H, HID, 1), jnp.float32,
                                -mix2_init, mix2_init)
    mix_b2 = jax.random.uniform(kb2, (H, 1), jnp.float32,
                                -mix2_init, mix2_init)

    out = mixed_scores_sdpa(q, k, v, dmat, mix_W1, mix_b1, mix_W2, mix_b2,
                            attn_mask=None, num_scores=NUM_SCORES)
    out = jax.block_until_ready(out)

    ref = _reference(q, k, v, dmat, mix_W1, mix_b1, mix_W2, mix_b2,
                     num_scores=NUM_SCORES)
    assert out.shape == (B, H, M, DV)
    assert jnp.allclose(out, ref, atol=1e-5, rtol=1e-5), "mismatch vs reference"
    # TODO(synk): dropout_p > 0 path (F.dropout on attention weights) not
    # implemented in-kernel; forward is exercised with dropout_p = 0.
    print("KERNEL_OK")
</pallas_src>

<mosaic_0001>
module attributes {stable_mosaic.version = 11 : i64} {
  func.func @_kernel_no_mask(%arg0: i32, %arg1: i32, %arg2: i32, %arg3: memref<1x1x16x16xf32, #tpu.memory_space<vmem>>, %arg4: memref<1x4x16x8xf32, #tpu.memory_space<vmem>>, %arg5: memref<1x4x8x16xf32, #tpu.memory_space<vmem>>, %arg6: memref<1x1x16x8xf32, #tpu.memory_space<vmem>>, %arg7: memref<4x32xf32, #tpu.memory_space<smem>>, %arg8: memref<4x16xf32, #tpu.memory_space<smem>>, %arg9: memref<4x16xf32, #tpu.memory_space<smem>>, %arg10: memref<1x4x16x16xf32, #tpu.memory_space<vmem>>) attributes {dimension_semantics = [#tpu.dimension_semantics<parallel>, #tpu.dimension_semantics<parallel>, #tpu.dimension_semantics<arbitrary>], iteration_bounds = array<i64: 2, 1, 4>, scalar_prefetch = 0 : i64, scratch_operands = 0 : i64, tpu.core_type = #tpu.core_type<tc>, window_params = [{transform_indices = @transform_0, window_bounds = array<i64: 1, 1, 16, 16>}, {transform_indices = @transform_1, window_bounds = array<i64: 1, 4, 16, 8>}, {transform_indices = @transform_2, window_bounds = array<i64: 1, 4, 8, 16>}, {transform_indices = @transform_3, window_bounds = array<i64: 1, 1, 16, 8>}, {transform_indices = @transform_4, window_bounds = array<i64: 4, 32>}, {transform_indices = @transform_5, window_bounds = array<i64: 4, 16>}, {transform_indices = @transform_6, window_bounds = array<i64: 4, 16>}, {transform_indices = @transform_7, window_bounds = array<i64: 1, 4, 16, 16>}]} {
    %0 = arith.index_cast %arg2 : i32 to index
    %c0 = arith.constant 0 : index
    %1 = memref.load %arg7[%0, %c0] : memref<4x32xf32, #tpu.memory_space<smem>>
    %2 = arith.index_cast %arg2 : i32 to index
    %c1 = arith.constant 1 : index
    %3 = memref.load %arg7[%2, %c1] : memref<4x32xf32, #tpu.memory_space<smem>>
    %4 = arith.index_cast %arg2 : i32 to index
    %c2 = arith.constant 2 : index
    %5 = memref.load %arg7[%4, %c2] : memref<4x32xf32, #tpu.memory_space<smem>>
    %6 = arith.index_cast %arg2 : i32 to index
    %c3 = arith.constant 3 : index
    %7 = memref.load %arg7[%6, %c3] : memref<4x32xf32, #tpu.memory_space<smem>>
    %8 = arith.index_cast %arg2 : i32 to index
    %c4 = arith.constant 4 : index
    %9 = memref.load %arg7[%8, %c4] : memref<4x32xf32, #tpu.memory_space<smem>>
    %10 = arith.index_cast %arg2 : i32 to index
    %c5 = arith.constant 5 : index
    %11 = memref.load %arg7[%10, %c5] : memref<4x32xf32, #tpu.memory_space<smem>>
    %12 = arith.index_cast %arg2 : i32 to index
    %c6 = arith.constant 6 : index
    %13 = memref.load %arg7[%12, %c6] : memref<4x32xf32, #tpu.memory_space<smem>>
    %14 = arith.index_cast %arg2 : i32 to index
    %c7 = arith.constant 7 : index
    %15 = memref.load %arg7[%14, %c7] : memref<4x32xf32, #tpu.memory_space<smem>>
    %16 = arith.index_cast %arg2 : i32 to index
    %c8 = arith.constant 8 : index
    %17 = memref.load %arg7[%16, %c8] : memref<4x32xf32, #tpu.memory_space<smem>>
    %18 = arith.index_cast %arg2 : i32 to index
    %c9 = arith.constant 9 : index
    %19 = memref.load %arg7[%18, %c9] : memref<4x32xf32, #tpu.memory_space<smem>>
    %20 = arith.index_cast %arg2 : i32 to index
    %c10 = arith.constant 10 : index
    %21 = memref.load %arg7[%20, %c10] : memref<4x32xf32, #tpu.memory_space<smem>>
    %22 = arith.index_cast %arg2 : i32 to index
    %c11 = arith.constant 11 : index
    %23 = memref.load %arg7[%22, %c11] : memref<4x32xf32, #tpu.memory_space<smem>>
    %24 = arith.index_cast %arg2 : i32 to index
    %c12 = arith.constant 12 : index
    %25 = memref.load %arg7[%24, %c12] : memref<4x32xf32, #tpu.memory_space<smem>>
    %26 = arith.index_cast %arg2 : i32 to index
    %c13 = arith.constant 13 : index
    %27 = memref.load %arg7[%26, %c13] : memref<4x32xf32, #tpu.memory_space<smem>>
    %28 = arith.index_cast %arg2 : i32 to index
    %c14 = arith.constant 14 : index
    %29 = memref.load %arg7[%28, %c14] : memref<4x32xf32, #tpu.memory_space<smem>>
    %30 = arith.index_cast %arg2 : i32 to index
    %c15 = arith.constant 15 : index
    %31 = memref.load %arg7[%30, %c15] : memref<4x32xf32, #tpu.memory_space<smem>>
    %32 = arith.index_cast %arg2 : i32 to index
    %c16 = arith.constant 16 : index
    %33 = memref.load %arg7[%32, %c16] : memref<4x32xf32, #tpu.memory_space<smem>>
    %34 = arith.index_cast %arg2 : i32 to index
    %c17 = arith.constant 17 : index
    %35 = memref.load %arg7[%34, %c17] : memref<4x32xf32, #tpu.memory_space<smem>>
    %36 = arith.index_cast %arg2 : i32 to index
    %c18 = arith.constant 18 : index
    %37 = memref.load %arg7[%36, %c18] : memref<4x32xf32, #tpu.memory_space<smem>>
    %38 = arith.index_cast %arg2 : i32 to index
    %c19 = arith.constant 19 : index
    %39 = memref.load %arg7[%38, %c19] : memref<4x32xf32, #tpu.memory_space<smem>>
    %40 = arith.index_cast %arg2 : i32 to index
    %c20 = arith.constant 20 : index
    %41 = memref.load %arg7[%40, %c20] : memref<4x32xf32, #tpu.memory_space<smem>>
    %42 = arith.index_cast %arg2 : i32 to index
    %c21 = arith.constant 21 : index
    %43 = memref.load %arg7[%42, %c21] : memref<4x32xf32, #tpu.memory_space<smem>>
    %44 = arith.index_cast %arg2 : i32 to index
    %c22 = arith.constant 22 : index
    %45 = memref.load %arg7[%44, %c22] : memref<4x32xf32, #tpu.memory_space<smem>>
    %46 = arith.index_cast %arg2 : i32 to index
    %c23 = arith.constant 23 : index
    %47 = memref.load %arg7[%46, %c23] : memref<4x32xf32, #tpu.memory_space<smem>>
    %48 = arith.index_cast %arg2 : i32 to index
    %c24 = arith.constant 24 : index
    %49 = memref.load %arg7[%48, %c24] : memref<4x32xf32, #tpu.memory_space<smem>>
    %50 = arith.index_cast %arg2 : i32 to index
    %c25 = arith.constant 25 : index
    %51 = memref.load %arg7[%50, %c25] : memref<4x32xf32, #tpu.memory_space<smem>>
    %52 = arith.index_cast %arg2 : i32 to index
    %c26 = arith.constant 26 : index
    %53 = memref.load %arg7[%52, %c26] : memref<4x32xf32, #tpu.memory_space<smem>>
    %54 = arith.index_cast %arg2 : i32 to index
    %c27 = arith.constant 27 : index
    %55 = memref.load %arg7[%54, %c27] : memref<4x32xf32, #tpu.memory_space<smem>>
    %56 = arith.index_cast %arg2 : i32 to index
    %c28 = arith.constant 28 : index
    %57 = memref.load %arg7[%56, %c28] : memref<4x32xf32, #tpu.memory_space<smem>>
    %58 = arith.index_cast %arg2 : i32 to index
    %c29 = arith.constant 29 : index
    %59 = memref.load %arg7[%58, %c29] : memref<4x32xf32, #tpu.memory_space<smem>>
    %60 = arith.index_cast %arg2 : i32 to index
    %c30 = arith.constant 30 : index
    %61 = memref.load %arg7[%60, %c30] : memref<4x32xf32, #tpu.memory_space<smem>>
    %62 = arith.index_cast %arg2 : i32 to index
    %c31 = arith.constant 31 : index
    %63 = memref.load %arg7[%62, %c31] : memref<4x32xf32, #tpu.memory_space<smem>>
    %64 = arith.index_cast %arg2 : i32 to index
    %c0_0 = arith.constant 0 : index
    %65 = memref.load %arg8[%64, %c0_0] : memref<4x16xf32, #tpu.memory_space<smem>>
    %66 = arith.index_cast %arg2 : i32 to index
    %c1_1 = arith.constant 1 : index
    %67 = memref.load %arg8[%66, %c1_1] : memref<4x16xf32, #tpu.memory_space<smem>>
    %68 = arith.index_cast %arg2 : i32 to index
    %c2_2 = arith.constant 2 : index
    %69 = memref.load %arg8[%68, %c2_2] : memref<4x16xf32, #tpu.memory_space<smem>>
    %70 = arith.index_cast %arg2 : i32 to index
    %c3_3 = arith.constant 3 : index
    %71 = memref.load %arg8[%70, %c3_3] : memref<4x16xf32, #tpu.memory_space<smem>>
    %72 = arith.index_cast %arg2 : i32 to index
    %c4_4 = arith.constant 4 : index
    %73 = memref.load %arg8[%72, %c4_4] : memref<4x16xf32, #tpu.memory_space<smem>>
    %74 = arith.index_cast %arg2 : i32 to index
    %c5_5 = arith.constant 5 : index
    %75 = memref.load %arg8[%74, %c5_5] : memref<4x16xf32, #tpu.memory_space<smem>>
    %76 = arith.index_cast %arg2 : i32 to index
    %c6_6 = arith.constant 6 : index
    %77 = memref.load %arg8[%76, %c6_6] : memref<4x16xf32, #tpu.memory_space<smem>>
    %78 = arith.index_cast %arg2 : i32 to index
    %c7_7 = arith.constant 7 : index
    %79 = memref.load %arg8[%78, %c7_7] : memref<4x16xf32, #tpu.memory_space<smem>>
    %80 = arith.index_cast %arg2 : i32 to index
    %c8_8 = arith.constant 8 : index
    %81 = memref.load %arg8[%80, %c8_8] : memref<4x16xf32, #tpu.memory_space<smem>>
    %82 = arith.index_cast %arg2 : i32 to index
    %c9_9 = arith.constant 9 : index
    %83 = memref.load %arg8[%82, %c9_9] : memref<4x16xf32, #tpu.memory_space<smem>>
    %84 = arith.index_cast %arg2 : i32 to index
    %c10_10 = arith.constant 10 : index
    %85 = memref.load %arg8[%84, %c10_10] : memref<4x16xf32, #tpu.memory_space<smem>>
    %86 = arith.index_cast %arg2 : i32 to index
    %c11_11 = arith.constant 11 : index
    %87 = memref.load %arg8[%86, %c11_11] : memref<4x16xf32, #tpu.memory_space<smem>>
    %88 = arith.index_cast %arg2 : i32 to index
    %c12_12 = arith.constant 12 : index
    %89 = memref.load %arg8[%88, %c12_12] : memref<4x16xf32, #tpu.memory_space<smem>>
    %90 = arith.index_cast %arg2 : i32 to index
    %c13_13 = arith.constant 13 : index
    %91 = memref.load %arg8[%90, %c13_13] : memref<4x16xf32, #tpu.memory_space<smem>>
    %92 = arith.index_cast %arg2 : i32 to index
    %c14_14 = arith.constant 14 : index
    %93 = memref.load %arg8[%92, %c14_14] : memref<4x16xf32, #tpu.memory_space<smem>>
    %94 = arith.index_cast %arg2 : i32 to index
    %c15_15 = arith.constant 15 : index
    %95 = memref.load %arg8[%94, %c15_15] : memref<4x16xf32, #tpu.memory_space<smem>>
    %96 = arith.index_cast %arg2 : i32 to index
    %c0_16 = arith.constant 0 : index
    %97 = memref.load %arg9[%96, %c0_16] : memref<4x16xf32, #tpu.memory_space<smem>>
    %98 = arith.index_cast %arg2 : i32 to index
    %c1_17 = arith.constant 1 : index
    %99 = memref.load %arg9[%98, %c1_17] : memref<4x16xf32, #tpu.memory_space<smem>>
    %100 = arith.index_cast %arg2 : i32 to index
    %c2_18 = arith.constant 2 : index
    %101 = memref.load %arg9[%100, %c2_18] : memref<4x16xf32, #tpu.memory_space<smem>>
    %102 = arith.index_cast %arg2 : i32 to index
    %c3_19 = arith.constant 3 : index
    %103 = memref.load %arg9[%102, %c3_19] : memref<4x16xf32, #tpu.memory_space<smem>>
    %104 = arith.index_cast %arg2 : i32 to index
    %c4_20 = arith.constant 4 : index
    %105 = memref.load %arg9[%104, %c4_20] : memref<4x16xf32, #tpu.memory_space<smem>>
    %106 = arith.index_cast %arg2 : i32 to index
    %c5_21 = arith.constant 5 : index
    %107 = memref.load %arg9[%106, %c5_21] : memref<4x16xf32, #tpu.memory_space<smem>>
    %108 = arith.index_cast %arg2 : i32 to index
    %c6_22 = arith.constant 6 : index
    %109 = memref.load %arg9[%108, %c6_22] : memref<4x16xf32, #tpu.memory_space<smem>>
    %110 = arith.index_cast %arg2 : i32 to index
    %c7_23 = arith.constant 7 : index
    %111 = memref.load %arg9[%110, %c7_23] : memref<4x16xf32, #tpu.memory_space<smem>>
    %112 = arith.index_cast %arg2 : i32 to index
    %c8_24 = arith.constant 8 : index
    %113 = memref.load %arg9[%112, %c8_24] : memref<4x16xf32, #tpu.memory_space<smem>>
    %114 = arith.index_cast %arg2 : i32 to index
    %c9_25 = arith.constant 9 : index
    %115 = memref.load %arg9[%114, %c9_25] : memref<4x16xf32, #tpu.memory_space<smem>>
    %116 = arith.index_cast %arg2 : i32 to index
    %c10_26 = arith.constant 10 : index
    %117 = memref.load %arg9[%116, %c10_26] : memref<4x16xf32, #tpu.memory_space<smem>>
    %118 = arith.index_cast %arg2 : i32 to index
    %c11_27 = arith.constant 11 : index
    %119 = memref.load %arg9[%118, %c11_27] : memref<4x16xf32, #tpu.memory_space<smem>>
    %120 = arith.index_cast %arg2 : i32 to index
    %c12_28 = arith.constant 12 : index
    %121 = memref.load %arg9[%120, %c12_28] : memref<4x16xf32, #tpu.memory_space<smem>>
    %122 = arith.index_cast %arg2 : i32 to index
    %c13_29 = arith.constant 13 : index
    %123 = memref.load %arg9[%122, %c13_29] : memref<4x16xf32, #tpu.memory_space<smem>>
    %124 = arith.index_cast %arg2 : i32 to index
    %c14_30 = arith.constant 14 : index
    %125 = memref.load %arg9[%124, %c14_30] : memref<4x16xf32, #tpu.memory_space<smem>>
    %126 = arith.index_cast %arg2 : i32 to index
    %c15_31 = arith.constant 15 : index
    %127 = memref.load %arg9[%126, %c15_31] : memref<4x16xf32, #tpu.memory_space<smem>>
    %c0_i32 = arith.constant 0 : i32
    %c2_i32 = arith.constant 2 : i32
    %128 = arith.addi %c0_i32, %c2_i32 : i32
    %c1_i32 = arith.constant 1 : i32
    scf.for %arg11 = %c0_i32 to %128 step %c1_i32  : i32 {
      %c8_i32 = arith.constant 8 : i32
      %129 = arith.muli %arg11, %c8_i32 : i32
      %130 = tpu.assume_multiple %129, 8 : i32
      %c0_33 = arith.constant 0 : index
      %c0_34 = arith.constant 0 : index
      %131 = arith.index_cast %130 : i32 to index
      %c0_35 = arith.constant 0 : index
      %132 = vector.load %arg3[%c0_33, %c0_34, %131, %c0_35] : memref<1x1x16x16xf32, #tpu.memory_space<vmem>>, vector<1x1x8x16xf32>
      %133 = vector.shape_cast %132 : vector<1x1x8x16xf32> to vector<8x16xf32>
      %c0_36 = arith.constant 0 : index
      %134 = arith.index_cast %arg2 : i32 to index
      %c0_37 = arith.constant 0 : index
      %c0_38 = arith.constant 0 : index
      %135 = vector.load %arg4[%c0_36, %134, %c0_37, %c0_38] : memref<1x4x16x8xf32, #tpu.memory_space<vmem>>, vector<1x1x16x8xf32>
      %136 = vector.shape_cast %135 : vector<1x1x16x8xf32> to vector<16x8xf32>
      %cst = arith.constant dense<0.000000e+00> : vector<8x8xf32>
      %137 = tpu.matmul %133, %136, %cst {dimension_numbers = #tpu.dot_dimension_numbers<[1], [0], [0], [1], [0, 0, 1, 1], [], []>} : vector<8x16xf32>, vector<16x8xf32>, vector<8x8xf32> -> vector<8x8xf32>
      %c0_39 = arith.constant 0 : index
      %c0_40 = arith.constant 0 : index
      %138 = arith.index_cast %130 : i32 to index
      %c0_41 = arith.constant 0 : index
      %139 = vector.load %arg6[%c0_39, %c0_40, %138, %c0_41] : memref<1x1x16x8xf32, #tpu.memory_space<vmem>>, vector<1x1x8x8xf32>
      %140 = vector.shape_cast %139 : vector<1x1x8x8xf32> to vector<8x8xf32>
      %cst_42 = arith.constant 0.000000e+00 : f32
      %141 = vector.broadcast %cst_42 : f32 to vector<8x8xf32>
      %142 = vector.broadcast %1 : f32 to vector<8x8xf32>
      %143 = arith.mulf %137, %142 : vector<8x8xf32>
      %144 = vector.broadcast %33 : f32 to vector<8x8xf32>
      %145 = arith.mulf %140, %144 : vector<8x8xf32>
      %146 = arith.addf %143, %145 : vector<8x8xf32>
      %147 = vector.broadcast %65 : f32 to vector<8x8xf32>
      %148 = arith.addf %146, %147 : vector<8x8xf32>
      %cst_43 = arith.constant 0.000000e+00 : f32
      %149 = vector.broadcast %cst_43 : f32 to vector<8x8xf32>
      %150 = arith.maximumf %148, %149 : vector<8x8xf32>
      %151 = vector.broadcast %97 : f32 to vector<8x8xf32>
      %152 = arith.mulf %150, %151 : vector<8x8xf32>
      %153 = arith.addf %141, %152 : vector<8x8xf32>
      %154 = vector.broadcast %3 : f32 to vector<8x8xf32>
      %155 = arith.mulf %137, %154 : vector<8x8xf32>
      %156 = vector.broadcast %35 : f32 to vector<8x8xf32>
      %157 = arith.mulf %140, %156 : vector<8x8xf32>
      %158 = arith.addf %155, %157 : vector<8x8xf32>
      %159 = vector.broadcast %67 : f32 to vector<8x8xf32>
      %160 = arith.addf %158, %159 : vector<8x8xf32>
      %cst_44 = arith.constant 0.000000e+00 : f32
      %161 = vector.broadcast %cst_44 : f32 to vector<8x8xf32>
      %162 = arith.maximumf %160, %161 : vector<8x8xf32>
      %163 = vector.broadcast %99 : f32 to vector<8x8xf32>
      %164 = arith.mulf %162, %163 : vector<8x8xf32>
      %165 = arith.addf %153, %164 : vector<8x8xf32>
      %166 = vector.broadcast %5 : f32 to vector<8x8xf32>
      %167 = arith.mulf %137, %166 : vector<8x8xf32>
      %168 = vector.broadcast %37 : f32 to vector<8x8xf32>
      %169 = arith.mulf %140, %168 : vector<8x8xf32>
      %170 = arith.addf %167, %169 : vector<8x8xf32>
      %171 = vector.broadcast %69 : f32 to vector<8x8xf32>
      %172 = arith.addf %170, %171 : vector<8x8xf32>
      %cst_45 = arith.constant 0.000000e+00 : f32
      %173 = vector.broadcast %cst_45 : f32 to vector<8x8xf32>
      %174 = arith.maximumf %172, %173 : vector<8x8xf32>
      %175 = vector.broadcast %101 : f32 to vector<8x8xf32>
      %176 = arith.mulf %174, %175 : vector<8x8xf32>
      %177 = arith.addf %165, %176 : vector<8x8xf32>
      %178 = vector.broadcast %7 : f32 to vector<8x8xf32>
      %179 = arith.mulf %137, %178 : vector<8x8xf32>
      %180 = vector.broadcast %39 : f32 to vector<8x8xf32>
      %181 = arith.mulf %140, %180 : vector<8x8xf32>
      %182 = arith.addf %179, %181 : vector<8x8xf32>
      %183 = vector.broadcast %71 : f32 to vector<8x8xf32>
      %184 = arith.addf %182, %183 : vector<8x8xf32>
      %cst_46 = arith.constant 0.000000e+00 : f32
      %185 = vector.broadcast %cst_46 : f32 to vector<8x8xf32>
      %186 = arith.maximumf %184, %185 : vector<8x8xf32>
      %187 = vector.broadcast %103 : f32 to vector<8x8xf32>
      %188 = arith.mulf %186, %187 : vector<8x8xf32>
      %189 = arith.addf %177, %188 : vector<8x8xf32>
      %190 = vector.broadcast %9 : f32 to vector<8x8xf32>
      %191 = arith.mulf %137, %190 : vector<8x8xf32>
      %192 = vector.broadcast %41 : f32 to vector<8x8xf32>
      %193 = arith.mulf %140, %192 : vector<8x8xf32>
      %194 = arith.addf %191, %193 : vector<8x8xf32>
      %195 = vector.broadcast %73 : f32 to vector<8x8xf32>
      %196 = arith.addf %194, %195 : vector<8x8xf32>
      %cst_47 = arith.constant 0.000000e+00 : f32
      %197 = vector.broadcast %cst_47 : f32 to vector<8x8xf32>
      %198 = arith.maximumf %196, %197 : vector<8x8xf32>
      %199 = vector.broadcast %105 : f32 to vector<8x8xf32>
      %200 = arith.mulf %198, %199 : vector<8x8xf32>
      %201 = arith.addf %189, %200 : vector<8x8xf32>
      %202 = vector.broadcast %11 : f32 to vector<8x8xf32>
      %203 = arith.mulf %137, %202 : vector<8x8xf32>
      %204 = vector.broadcast %43 : f32 to vector<8x8xf32>
      %205 = arith.mulf %140, %204 : vector<8x8xf32>
      %206 = arith.addf %203, %205 : vector<8x8xf32>
      %207 = vector.broadcast %75 : f32 to vector<8x8xf32>
      %208 = arith.addf %206, %207 : vector<8x8xf32>
      %cst_48 = arith.constant 0.000000e+00 : f32
      %209 = vector.broadcast %cst_48 : f32 to vector<8x8xf32>
      %210 = arith.maximumf %208, %209 : vector<8x8xf32>
      %211 = vector.broadcast %107 : f32 to vector<8x8xf32>
      %212 = arith.mulf %210, %211 : vector<8x8xf32>
      %213 = arith.addf %201, %212 : vector<8x8xf32>
      %214 = vector.broadcast %13 : f32 to vector<8x8xf32>
      %215 = arith.mulf %137, %214 : vector<8x8xf32>
      %216 = vector.broadcast %45 : f32 to vector<8x8xf32>
      %217 = arith.mulf %140, %216 : vector<8x8xf32>
      %218 = arith.addf %215, %217 : vector<8x8xf32>
      %219 = vector.broadcast %77 : f32 to vector<8x8xf32>
      %220 = arith.addf %218, %219 : vector<8x8xf32>
      %cst_49 = arith.constant 0.000000e+00 : f32
      %221 = vector.broadcast %cst_49 : f32 to vector<8x8xf32>
      %222 = arith.maximumf %220, %221 : vector<8x8xf32>
      %223 = vector.broadcast %109 : f32 to vector<8x8xf32>
      %224 = arith.mulf %222, %223 : vector<8x8xf32>
      %225 = arith.addf %213, %224 : vector<8x8xf32>
      %226 = vector.broadcast %15 : f32 to vector<8x8xf32>
      %227 = arith.mulf %137, %226 : vector<8x8xf32>
      %228 = vector.broadcast %47 : f32 to vector<8x8xf32>
      %229 = arith.mulf %140, %228 : vector<8x8xf32>
      %230 = arith.addf %227, %229 : vector<8x8xf32>
      %231 = vector.broadcast %79 : f32 to vector<8x8xf32>
      %232 = arith.addf %230, %231 : vector<8x8xf32>
      %cst_50 = arith.constant 0.000000e+00 : f32
      %233 = vector.broadcast %cst_50 : f32 to vector<8x8xf32>
      %234 = arith.maximumf %232, %233 : vector<8x8xf32>
      %235 = vector.broadcast %111 : f32 to vector<8x8xf32>
      %236 = arith.mulf %234, %235 : vector<8x8xf32>
      %237 = arith.addf %225, %236 : vector<8x8xf32>
      %238 = vector.broadcast %17 : f32 to vector<8x8xf32>
      %239 = arith.mulf %137, %238 : vector<8x8xf32>
      %240 = vector.broadcast %49 : f32 to vector<8x8xf32>
      %241 = arith.mulf %140, %240 : vector<8x8xf32>
      %242 = arith.addf %239, %241 : vector<8x8xf32>
      %243 = vector.broadcast %81 : f32 to vector<8x8xf32>
      %244 = arith.addf %242, %243 : vector<8x8xf32>
      %cst_51 = arith.constant 0.000000e+00 : f32
      %245 = vector.broadcast %cst_51 : f32 to vector<8x8xf32>
      %246 = arith.maximumf %244, %245 : vector<8x8xf32>
      %247 = vector.broadcast %113 : f32 to vector<8x8xf32>
      %248 = arith.mulf %246, %247 : vector<8x8xf32>
      %249 = arith.addf %237, %248 : vector<8x8xf32>
      %250 = vector.broadcast %19 : f32 to vector<8x8xf32>
      %251 = arith.mulf %137, %250 : vector<8x8xf32>
      %252 = vector.broadcast %51 : f32 to vector<8x8xf32>
      %253 = arith.mulf %140, %252 : vector<8x8xf32>
      %254 = arith.addf %251, %253 : vector<8x8xf32>
      %255 = vector.broadcast %83 : f32 to vector<8x8xf32>
      %256 = arith.addf %254, %255 : vector<8x8xf32>
      %cst_52 = arith.constant 0.000000e+00 : f32
      %257 = vector.broadcast %cst_52 : f32 to vector<8x8xf32>
      %258 = arith.maximumf %256, %257 : vector<8x8xf32>
      %259 = vector.broadcast %115 : f32 to vector<8x8xf32>
      %260 = arith.mulf %258, %259 : vector<8x8xf32>
      %261 = arith.addf %249, %260 : vector<8x8xf32>
      %262 = vector.broadcast %21 : f32 to vector<8x8xf32>
      %263 = arith.mulf %137, %262 : vector<8x8xf32>
      %264 = vector.broadcast %53 : f32 to vector<8x8xf32>
      %265 = arith.mulf %140, %264 : vector<8x8xf32>
      %266 = arith.addf %263, %265 : vector<8x8xf32>
      %267 = vector.broadcast %85 : f32 to vector<8x8xf32>
      %268 = arith.addf %266, %267 : vector<8x8xf32>
      %cst_53 = arith.constant 0.000000e+00 : f32
      %269 = vector.broadcast %cst_53 : f32 to vector<8x8xf32>
      %270 = arith.maximumf %268, %269 : vector<8x8xf32>
      %271 = vector.broadcast %117 : f32 to vector<8x8xf32>
      %272 = arith.mulf %270, %271 : vector<8x8xf32>
      %273 = arith.addf %261, %272 : vector<8x8xf32>
      %274 = vector.broadcast %23 : f32 to vector<8x8xf32>
      %275 = arith.mulf %137, %274 : vector<8x8xf32>
      %276 = vector.broadcast %55 : f32 to vector<8x8xf32>
      %277 = arith.mulf %140, %276 : vector<8x8xf32>
      %278 = arith.addf %275, %277 : vector<8x8xf32>
      %279 = vector.broadcast %87 : f32 to vector<8x8xf32>
      %280 = arith.addf %278, %279 : vector<8x8xf32>
      %cst_54 = arith.constant 0.000000e+00 : f32
      %281 = vector.broadcast %cst_54 : f32 to vector<8x8xf32>
      %282 = arith.maximumf %280, %281 : vector<8x8xf32>
      %283 = vector.broadcast %119 : f32 to vector<8x8xf32>
      %284 = arith.mulf %282, %283 : vector<8x8xf32>
      %285 = arith.addf %273, %284 : vector<8x8xf32>
      %286 = vector.broadcast %25 : f32 to vector<8x8xf32>
      %287 = arith.mulf %137, %286 : vector<8x8xf32>
      %288 = vector.broadcast %57 : f32 to vector<8x8xf32>
      %289 = arith.mulf %140, %288 : vector<8x8xf32>
      %290 = arith.addf %287, %289 : vector<8x8xf32>
      %291 = vector.broadcast %89 : f32 to vector<8x8xf32>
      %292 = arith.addf %290, %291 : vector<8x8xf32>
      %cst_55 = arith.constant 0.000000e+00 : f32
      %293 = vector.broadcast %cst_55 : f32 to vector<8x8xf32>
      %294 = arith.maximumf %292, %293 : vector<8x8xf32>
      %295 = vector.broadcast %121 : f32 to vector<8x8xf32>
      %296 = arith.mulf %294, %295 : vector<8x8xf32>
      %297 = arith.addf %285, %296 : vector<8x8xf32>
      %298 = vector.broadcast %27 : f32 to vector<8x8xf32>
      %299 = arith.mulf %137, %298 : vector<8x8xf32>
      %300 = vector.broadcast %59 : f32 to vector<8x8xf32>
      %301 = arith.mulf %140, %300 : vector<8x8xf32>
      %302 = arith.addf %299, %301 : vector<8x8xf32>
      %303 = vector.broadcast %91 : f32 to vector<8x8xf32>
      %304 = arith.addf %302, %303 : vector<8x8xf32>
      %cst_56 = arith.constant 0.000000e+00 : f32
      %305 = vector.broadcast %cst_56 : f32 to vector<8x8xf32>
      %306 = arith.maximumf %304, %305 : vector<8x8xf32>
      %307 = vector.broadcast %123 : f32 to vector<8x8xf32>
      %308 = arith.mulf %306, %307 : vector<8x8xf32>
      %309 = arith.addf %297, %308 : vector<8x8xf32>
      %310 = vector.broadcast %29 : f32 to vector<8x8xf32>
      %311 = arith.mulf %137, %310 : vector<8x8xf32>
      %312 = vector.broadcast %61 : f32 to vector<8x8xf32>
      %313 = arith.mulf %140, %312 : vector<8x8xf32>
      %314 = arith.addf %311, %313 : vector<8x8xf32>
      %315 = vector.broadcast %93 : f32 to vector<8x8xf32>
      %316 = arith.addf %314, %315 : vector<8x8xf32>
      %cst_57 = arith.constant 0.000000e+00 : f32
      %317 = vector.broadcast %cst_57 : f32 to vector<8x8xf32>
      %318 = arith.maximumf %316, %317 : vector<8x8xf32>
      %319 = vector.broadcast %125 : f32 to vector<8x8xf32>
      %320 = arith.mulf %318, %319 : vector<8x8xf32>
      %321 = arith.addf %309, %320 : vector<8x8xf32>
      %322 = vector.broadcast %31 : f32 to vector<8x8xf32>
      %323 = arith.mulf %137, %322 : vector<8x8xf32>
      %324 = vector.broadcast %63 : f32 to vector<8x8xf32>
      %325 = arith.mulf %140, %324 : vector<8x8xf32>
      %326 = arith.addf %323, %325 : vector<8x8xf32>
      %327 = vector.broadcast %95 : f32 to vector<8x8xf32>
      %328 = arith.addf %326, %327 : vector<8x8xf32>
      %cst_58 = arith.constant 0.000000e+00 : f32
      %329 = vector.broadcast %cst_58 : f32 to vector<8x8xf32>
      %330 = arith.maximumf %328, %329 : vector<8x8xf32>
      %331 = vector.broadcast %127 : f32 to vector<8x8xf32>
      %332 = arith.mulf %330, %331 : vector<8x8xf32>
      %333 = arith.addf %321, %332 : vector<8x8xf32>
      %cst_59 = arith.constant dense<0xFF800000> : vector<8xf32>
      %334 = vector.multi_reduction <maximumf>, %333, %cst_59 [1] : vector<8x8xf32> to vector<8xf32>
      %335 = vector.shape_cast %334 : vector<8xf32> to vector<8x1xf32>
      %336 = vector.broadcast %335 : vector<8x1xf32> to vector<8x8xf32>
      %337 = arith.subf %333, %336 : vector<8x8xf32>
      %338 = math.exp %337 : vector<8x8xf32>
      %cst_60 = arith.constant dense<0.000000e+00> : vector<8xf32>
      %339 = vector.multi_reduction <add>, %338, %cst_60 [1] : vector<8x8xf32> to vector<8xf32>
      %340 = vector.shape_cast %339 : vector<8xf32> to vector<8x1xf32>
      %341 = tpu.reciprocal %340 : vector<8x1xf32> -> vector<8x1xf32>
      %342 = vector.broadcast %341 : vector<8x1xf32> to vector<8x8xf32>
      %343 = arith.mulf %338, %342 : vector<8x8xf32>
      %c0_61 = arith.constant 0 : index
      %344 = arith.index_cast %arg2 : i32 to index
      %c0_62 = arith.constant 0 : index
      %c0_63 = arith.constant 0 : index
      %345 = vector.load %arg5[%c0_61, %344, %c0_62, %c0_63] : memref<1x4x8x16xf32, #tpu.memory_space<vmem>>, vector<1x1x8x16xf32>
      %346 = vector.shape_cast %345 : vector<1x1x8x16xf32> to vector<8x16xf32>
      %cst_64 = arith.constant dense<0.000000e+00> : vector<8x16xf32>
      %347 = tpu.matmul %343, %346, %cst_64 {dimension_numbers = #tpu.dot_dimension_numbers<[1], [0], [0], [1], [0, 0, 1, 1], [], []>} : vector<8x8xf32>, vector<8x16xf32>, vector<8x16xf32> -> vector<8x16xf32>
      %c0_65 = arith.constant 0 : index
      %348 = arith.index_cast %arg2 : i32 to index
      %349 = arith.index_cast %130 : i32 to index
      %c0_66 = arith.constant 0 : index
      %350 = vector.load %arg10[%c0_65, %348, %349, %c0_66] : memref<1x4x16x16xf32, #tpu.memory_space<vmem>>, vector<1x1x8x16xf32>
      %351 = vector.shape_cast %350 : vector<1x1x8x16xf32> to vector<8x16xf32>
      %352 = vector.shape_cast %347 : vector<8x16xf32> to vector<1x1x8x16xf32>
      tpu.vector_store %arg10[%c0_65, %348, %349, %c0_66], %352 {strides = array<i32>} : memref<1x4x16x16xf32, #tpu.memory_space<vmem>>, vector<1x1x8x16xf32>,
    }
    %c2_i32_32 = arith.constant 2 : i32
    return
  }
  func.func @transform_0(%arg0: i32, %arg1: i32, %arg2: i32) -> (i32, i32, i32, i32) {
    %c0_i32 = arith.constant 0 : i32
    %c0_i32_0 = arith.constant 0 : i32
    return %arg0, %arg2, %arg1, %c0_i32 : i32, i32, i32, i32
  }
  func.func @transform_1(%arg0: i32, %arg1: i32, %arg2: i32) -> (i32, i32, i32, i32) {
    %c0_i32 = arith.constant 0 : i32
    %c0_i32_0 = arith.constant 0 : i32
    %c0_i32_1 = arith.constant 0 : i32
    %c0_i32_2 = arith.constant 0 : i32
    return %arg0, %c0_i32, %c0_i32_0, %c0_i32_1 : i32, i32, i32, i32
  }
  func.func @transform_2(%arg0: i32, %arg1: i32, %arg2: i32) -> (i32, i32, i32, i32) {
    %c0_i32 = arith.constant 0 : i32
    %c0_i32_0 = arith.constant 0 : i32
    %c0_i32_1 = arith.constant 0 : i32
    %c0_i32_2 = arith.constant 0 : i32
    return %arg0, %c0_i32, %c0_i32_0, %c0_i32_1 : i32, i32, i32, i32
  }
  func.func @transform_3(%arg0: i32, %arg1: i32, %arg2: i32) -> (i32, i32, i32, i32) {
    %c0_i32 = arith.constant 0 : i32
    %c0_i32_0 = arith.constant 0 : i32
    %c0_i32_1 = arith.constant 0 : i32
    return %arg0, %c0_i32, %arg1, %c0_i32_0 : i32, i32, i32, i32
  }
  func.func @transform_4(%arg0: i32, %arg1: i32, %arg2: i32) -> (i32, i32) {
    %c0_i32 = arith.constant 0 : i32
    %c0_i32_0 = arith.constant 0 : i32
    %c0_i32_1 = arith.constant 0 : i32
    return %c0_i32, %c0_i32_0 : i32, i32
  }
  func.func @transform_5(%arg0: i32, %arg1: i32, %arg2: i32) -> (i32, i32) {
    %c0_i32 = arith.constant 0 : i32
    %c0_i32_0 = arith.constant 0 : i32
    %c0_i32_1 = arith.constant 0 : i32
    return %c0_i32, %c0_i32_0 : i32, i32
  }
  func.func @transform_6(%arg0: i32, %arg1: i32, %arg2: i32) -> (i32, i32) {
    %c0_i32 = arith.constant 0 : i32
    %c0_i32_0 = arith.constant 0 : i32
    %c0_i32_1 = arith.constant 0 : i32
    return %c0_i32, %c0_i32_0 : i32, i32
  }
  func.func @transform_7(%arg0: i32, %arg1: i32, %arg2: i32) -> (i32, i32, i32, i32) {
    %c0_i32 = arith.constant 0 : i32
    %c0_i32_0 = arith.constant 0 : i32
    %c0_i32_1 = arith.constant 0 : i32
    return %arg0, %c0_i32, %arg1, %c0_i32_0 : i32, i32, i32, i32
  }
}

</mosaic_0001>

<bundles_post_ra>
// kernel: tpu_custom_call.1
= control target key start
LH: loop header
LB: loop body
LE: loop exit
PB: predicated region body
PF: predicated region fallthrough
CT: control target
= control target key end

     0   :  { %s2080_s0 = inlined_call_operand.vmem [shape: f32[2,4,16,16], index: 0, kind: input, shape index: {}]   ;;  %s2081_s1 = inlined_call_operand.vmem [shape: f32[2,4,16,8], index: 1, kind: input, shape index: {}]   ;;  %s2082_s2 = inlined_call_operand.vmem [shape: f32[2,4,8,16], index: 2, kind: input, shape index: {}]   ;;  %s2083_s3 = inlined_call_operand.vmem [shape: f32[2,1,16,8], index: 3, kind: input, shape index: {}]   ;;  %s2084_s4 = inlined_call_operand.vmem [shape: f32[4,32], index: 4, kind: input, shape index: {}]   ;;  %s2085_s5 = inlined_call_operand.vmem [shape: f32[4,16], index: 5, kind: input, shape index: {}]   ;;  %s2086_s6 = inlined_call_operand.vmem [shape: f32[4,16], index: 6, kind: input, shape index: {}]   ;;  %s2087_s7 = inlined_call_operand.hbm [shape: f32[2,4,16,16], index: 7, kind: output, shape index: {}]  }
   0x1   :  { %2115 = sst [smem:[#allocation83_spill]] %s2080_s0 }
   0x2   :  { %2116 = sst [smem:[#allocation84_spill]] %s2081_s1 }
   0x3   :  { %2117 = sst [smem:[#allocation85_spill]] %s2082_s2 }
   0x4   :  { %2118 = sst [smem:[#allocation86_spill]] %s2083_s3 }
   0x5   :  { %2119 = sst [smem:[#allocation87_spill]] %s2084_s4 }
   0x6   :  { %2120 = sst [smem:[#allocation88_spill]] %s2085_s5 }
   0x7   :  { %2121 = sst [smem:[#allocation89_spill]] %s2086_s6 }
   0x8   :  { %2122 = sst [smem:[#allocation90_spill]] %s2087_s7 }
   0x9   :  { %12 = vsyncpa [#allocation4], 0 }
   0xa   :  { %13 = vsyncpa [#allocation6], 0 }
   0xb   :  { %14 = vsyncpa [#allocation3], 0 }
   0xc   :  { %16 = vsyncpa [#allocation3 + $0x1], 0  ;;  %s1474_s24 = smov 0   ;;  %s1476_s25 = smov 0  }
   0xd   :  { %s1478_s26 = smov 0   ;;  %s1480_s27 = smov 0  }
   0xe   :  { %s1482_s28 = smov 0   ;;  %s1484_s29 = smov 0  }
   0xf   :  { %s1486_s30 = smov 0   ;;  %s1488_s8 = smov 0  }
  0x10 LB: > { %2123 = sst [smem:[#allocation12_spill]] %s1391_s24  ;;  %s1093_s9 = sadd.s32 4294967295, %s1419_s8   ;;  %s1419_s8 = sphi %s1488_s8, %s22_s8   ;;  %s1415_s30 = sphi %s1486_s30, %s2289_s30   ;;  %s1411_s29 = sphi %s1484_s29, %s2288_s29   ;;  %s1407_s28 = sphi %s1482_s28, %s2287_s28   ;;  %s1403_s27 = sphi %s1480_s27, %s2286_s27   ;;  %s1399_s26 = sphi %s1478_s26, %s2285_s26   ;;  %s1395_s25 = sphi %s1476_s25, %s2284_s25   ;;  %s1391_s24 = sphi %s1474_s24, %s2283_s24  }
  0x11   : > { %2124 = sst [smem:[#allocation13_spill]] %s1395_s25  ;;  %s1094_s10 = sadd.s32 4294967294, %s1419_s8  }
  0x12   : > { %2125 = sst [smem:[#allocation14_spill]] %s1399_s26  ;;  %s34_s11 = sadd.s32 1, %s1411_s29 }
  0x13   : > { %2126 = sst [smem:[#allocation15_spill]] %s1403_s27  ;;  %s41_s12 = sadd.s32 1, %s1415_s30 }
  0x14   : > { %2127 = sst [smem:[#allocation16_spill]] %s1407_s28  ;;  %p35_p0 = scmp.ge.s32.totalorder %s34_s11, 4 }
  0x15   : > { %2128 = sst [smem:[#allocation17_spill]] %s1411_s29  ;;  %s223_s13 = sadd.s32 1, %s1399_s26 }
  0x16   : > { %2129 = sst [smem:[#allocation18_spill]] %s1415_s30  ;;  %p233_p1 = scmp.ne.s32.totalorder %s1399_s26, %s1395_s25 }
  0x17   : > { %2130 = sst [smem:[#allocation19_spill]] %s1419_s8  ;;  %p234_p2 = scmp.eq.s32.totalorder %s1093_s9, 7 }
  0x18   : > { %s2291_s11 = smov (%p35_p0, %s34_s11), 0  ;;  %s2293_s12 = smov (!%p35_p0, %s41_s12), %s1415_s30 }
  0x19   : > { %2131 = sst [smem:[#allocation20_spill]] %s2291_s11  ;;  %p1524_p3 = por %p234_p2, %p233_p1 }
  0x1a   : > { %p239_p4 = scmp.ne.s32.totalorder %s1395_s25, %s1391_s24  ;;  %p43_p5 = scmp.ge.s32.totalorder %s2293_s12, 2 }
  0x1b   : > { %s2132_s14 = scalar_select %p1524_p3, 1, 0 }
  0x1c   : > { %p240_p6 = scmp.eq.s32.totalorder %s1094_s10, 7  ;;  %p1095_p7 = scmp.ge.s32.totalorder %s1419_s8, 1 }
  0x1d   : > { %2133 = sst [smem:[#allocation21_spill]] %s2132_s14  ;;  %p247_p8 = scmp.lt.s32.totalorder %s1419_s8, 9 }
  0x1e   : > { %s2295_s12 = smov (%p43_p5, %s2293_s12), 0  ;;  %p1534_p9 = por %p240_p6, %p239_p4 }
  0x1f   : > { %2134 = sst [smem:[#allocation22_spill]] %s2295_s12  ;;  %p1538_p10 = pnand %p1095_p7, %p247_p8 }
  0x20   : > { %s2135_s15 = scalar_select %p1534_p9, 1, 0 }
  0x21   : > { %s2137_s16 = scalar_select %p1538_p10, 1, 0 }
  0x22   : > { %2136 = sst [smem:[#allocation23_spill]] %s2135_s15  ;;  %s218_s17 = ssub.s32 %s1415_s30, %s2295_s12 }
  0x23   : > { %p221_p11 = scmp.eq.s32.totalorder %s218_s17, 0  ;;  %p1163_p12 = pneg %p1538_p10 }
  0x24   : > { %p1546_p13 = scmp.eq.s32.totalorder %s1093_s9, 0  ;;  %s2139_s5 = sld [smem:[#allocation88_spill]] }
  0x25   : > { %s1554_s22 = scalar_select %p221_p11, %s1399_s26, %s223_s13  }
  0x26   : > { %s2138_s18 = scalar_select %p1546_p13, 1, 0 }
  0x27   : > { %2140 = sst [smem:[#allocation24_spill]] %s1554_s22  ;;  %p1558_p0 = pnand %p1546_p13, %p1163_p12 }
  0x29   : > { %p1270_p2 = pneg %p1558_p0 }
  0x2a   : > { %s271_s21 = sshll.u32 %s2139_s5, 4  ;;  %s272_s21 = int_to_ptr.vmem [resolvable:$true] %s271_s21 }
  0x2b   : > { %s1268_s10 = scalar_lea.vmem %s272_s21, 64  ;;  %p1276_p6 = scmp.lt.s32.totalorder %s272_s21, %s272_s21 }
  0x2c   : > { %p1269_p1 = scmp.ne.s32.totalorder %s272_s21, %s1268_s10  ;;  %p1277_p7 = scmp.lt.s32.totalorder %s1268_s10, %s1268_s10 }
  0x2e   : > { %p1271_p4 = pnand %p1270_p2, %p1269_p1  ;;  %p1278_p8 = por %p1277_p7, %p1276_p6 }
  0x30   : > { %p1272_p5 = pneg %p1271_p4 }
  0x32   : > { %p1279_p11 = pnand %p1278_p8, %p1272_p5 }
  0x34   : > { %1282 = shalt.err (!%p1279_p11)
}
  0x35   : > { %s1425_s9 = smov [#allocation5]   ;;  %s2142_s4 = sld [smem:[#allocation87_spill]] }
  0x36   : > { %1169 = dma.vmem_to_smem (!%p1558_p0), %s272_s21, 64, %s1425_s9, [#allocation6]  }
  0x37   : > { %s2143_s6 = sld [smem:[#allocation89_spill]] }
  0x3b   : > { %s260_s19 = sshll.u32 %s2142_s4, 4  ;;  %s261_s19 = int_to_ptr.vmem [resolvable:$true] %s260_s19 }
  0x3c   : > { %s1283_s11 = scalar_lea.vmem %s261_s19, 64  ;;  %p1291_p5 = scmp.lt.s32.totalorder %s261_s19, %s261_s19 }
  0x3d   : > { %s282_s12 = sshll.u32 %s2143_s6, 4  ;;  %p1284_p12 = scmp.ne.s32.totalorder %s261_s19, %s1283_s11  ;;  %s283_s12 = int_to_ptr.vmem [resolvable:$true] %s282_s12 }
  0x3e   : > { %p1292_p6 = scmp.lt.s32.totalorder %s1283_s11, %s1283_s11 }
  0x3f   : > { %p1286_p1 = pnand %p1284_p12, %p1270_p2 }
  0x40   : > { %p1293_p7 = por %p1292_p6, %p1291_p5 }
  0x41   : > { %p1287_p4 = pneg %p1286_p1 }
  0x43   : > { %p1294_p8 = pnand %p1293_p7, %p1287_p4 }
  0x45   : > { %1297 = shalt.err (!%p1294_p8)
}
  0x46   : > { %s1426_s21 = smov [#allocation2]   ;;  %s1298_s10 = scalar_lea.vmem %s283_s12, 64 }
  0x47   : > { %1166 = dma.vmem_to_smem (!%p1558_p0), %s261_s19, 64, %s1426_s21, [#allocation4]  }
  0x48   : > { %p1299_p11 = scmp.ne.s32.totalorder %s283_s12, %s1298_s10  ;;  %p1306_p13 = scmp.lt.s32.totalorder %s283_s12, %s283_s12 }
  0x49   : > { %p1307_p12 = scmp.lt.s32.totalorder %s1298_s10, %s1298_s10 }
  0x4a   : > { %p1301_p9 = pnand %p1299_p11, %p1270_p2 }
  0x4b   : > { %p1308_p1 = por %p1307_p12, %p1306_p13 }
  0x4c   : > { %p1302_p3 = pneg %p1301_p9 }
  0x4e   : > { %p1309_p10 = pnand %p1308_p1, %p1302_p3 }
  0x50   : > { %1312 = shalt.err (!%p1309_p10)
}
  0x51   : > { %s1427_s5 = smov [#allocation7]   ;;  %p2144_p4 = scmp.ne.s32.totalorder %s2137_s16, 0 }
  0x52   : > { %1172 = dma.vmem_to_smem (!%p1558_p0), %s283_s12, 64, %s1427_s5, [#allocation6]  }
  0x53   : > { %341 = sbr.rel (%p2144_p4) target bundleno = 1036 (0x40c), region = 48 }
  0x5a   : > { %p2145_p5 = scmp.ne.s32.totalorder %s2138_s18, 0 }
  0x5c   : > { %1378 = dma.done.wait (%p2145_p5), [#allocation4], 64  }
  0x5d   : > { %1380 = vsyncadd (%p2145_p5), [#allocation4], 4294967232 }
  0x5e   : > { %1382 = dma.done.wait (%p2145_p5), [#allocation6], 128  }
  0x5f   : > { %1384 = vsyncadd (%p2145_p5), [#allocation6], 4294967168 }
  0x60   : > { %355 = sfence }
  0x61   : > { %s2093_s11 = sand.u32 1, %s1395_s25   ;;  %p410_p3 = scmp.lt.s32.totalorder %s1407_s28, 1 }
  0x62   : > { %s1599_s12 = sshll.u32 %s2093_s11, 6  ;;  %p412_p9 = scmp.lt.s32.totalorder %s1403_s27, 3 }
  0x63   : > { %2146 = sst [smem:[#allocation25_spill]] %s1599_s12  ;;  %s1603_s16 = sshll.u32 %s1403_s27, 7 }
  0x64   : > { %s411_s18 = scalar_select %p410_p3, %s1407_s28, 1 }
  0x65   : > { %s413_s23 = scalar_select %p412_p9, %s1403_s27, 3 }
  0x66   : > { %s1106_s9 = sshll.u32 %s411_s18, 3  ;;  %s1125_s13 = sshll.u32 %s411_s18, 6 }
  0x67   : > { %s1105_s17 = sshll.u32 %s413_s23, 1  ;;  %s2147_s1 = sld [smem:[#allocation84_spill]] }
  0x68   : > { %s419_s10 = sadd.s32 %s1106_s9, %s1105_s17  ;;  %s1126_s5 = sshll.u32 %s411_s18, 5 }
  0x69   : > { %s1107_s11 = sshll.u32 %s419_s10, 3  ;;  %s2149_s2 = sld [smem:[#allocation85_spill]] }
  0x6a   : > { %s2151_s0 = sld [smem:[#allocation83_spill]]  ;;  %s1127_s23 = sshll.u32 %s411_s18, 4 }
  0x6b   : > { %s2153_s3 = sld [smem:[#allocation86_spill]]  ;;  %s1631_s20 = sadd.s32 1, %s1603_s16 }
  0x6c   : > { %s1628_s17 = sld [smem:[#allocation2 + %s1603_s16]]  ;;  %s1634_s4 = sadd.s32 2, %s1603_s16 }
  0x6d   : > { %s1610_s21 = scalar_lea.vmem %s2147_s1, %s1125_s13  ;;  %s1637_s6 = sld [smem:[#allocation2 + %s1631_s20]] }
  0x6e   : > { %2148 = sst [smem:[#allocation26_spill]] %s1610_s21  ;;  %s1643_s22 = sadd.s32 3, %s1603_s16 }
  0x6f   : > { %s1615_s30 = scalar_lea.vmem %s2149_s2, %s1126_s5  ;;  %s1640_s29 = sld [smem:[#allocation2 + %s1634_s4]] }
  0x70   : > { %2150 = sst [smem:[#allocation27_spill]] %s1615_s30  ;;  %s1620_s26 = scalar_lea.vmem %s2151_s0, %s1107_s11 }
  0x71   : > { %2152 = sst [smem:[#allocation28_spill]] %s1620_s26  ;;  %s1625_s9 = scalar_lea.vmem %s2153_s3, %s1127_s23 }
  0x72   : > { %2154 = sst [smem:[#allocation29_spill]] %s1625_s9  ;;  %s1646_s11 = sadd.s32 4, %s1603_s16 }
  0x73   : > { %2155 = sst [smem:[#allocation30_spill]] %s1628_s17  ;;  %s1655_s5 = sadd.s32 5, %s1603_s16 }
  0x74   : > { %2156 = sst [smem:[#allocation31_spill]] %s1637_s6  ;;  %s1658_s23 = sadd.s32 6, %s1603_s16 }
  0x75   : > { %2157 = sst [smem:[#allocation32_spill]] %s1640_s29  ;;  %s1667_s0 = sadd.s32 7, %s1603_s16 }
  0x76   : > { %s1649_s18 = sld [smem:[#allocation2 + %s1643_s22]]  ;;  %s1670_s1 = sadd.s32 8, %s1603_s16 }
  0x77   : > { %s1652_s10 = sld [smem:[#allocation2 + %s1646_s11]]  ;;  %s1679_s15 = sadd.s32 9, %s1603_s16 }
  0x78   : > { %s1661_s19 = sld [smem:[#allocation2 + %s1655_s5]]  ;;  %s1682_s24 = sadd.s32 10, %s1603_s16 }
  0x79   : > { %s1664_s13 = sld [smem:[#allocation2 + %s1658_s23]]  ;;  %s1691_s14 = sadd.s32 11, %s1603_s16 }
  0x7a   : > { %s1673_s2 = sld [smem:[#allocation2 + %s1667_s0]]  ;;  %s1694_s25 = sadd.s32 12, %s1603_s16 }
  0x7b   : > { %s1676_s3 = sld [smem:[#allocation2 + %s1670_s1]]  ;;  %s486_s26 = sadd.s32 21, %s1603_s16 }
  0x7c   : > { %2158 = sst [smem:[#allocation33_spill]] %s1649_s18  ;;  %s480_s18 = sadd.s32 18, %s1603_s16 }
  0x7d   : > { %2159 = sst [smem:[#allocation34_spill]] %s1652_s10  ;;  %s478_s10 = sadd.s32 17, %s1603_s16 }
  0x7e   : > { %2160 = sst [smem:[#allocation35_spill]] %s1661_s19  ;;  %s476_s19 = sadd.s32 16, %s1603_s16 }
  0x7f   : > { %2161 = sst [smem:[#allocation36_spill]] %s1664_s13  ;;  %s1715_s13 = sadd.s32 15, %s1603_s16 }
  0x80   : > { %2162 = sst [smem:[#allocation37_spill]] %s1673_s2  ;;  %s1706_s2 = sadd.s32 14, %s1603_s16 }
  0x81   : > { %2163 = sst [smem:[#allocation38_spill]] %s1676_s3  ;;  %s1703_s3 = sadd.s32 13, %s1603_s16 }
  0x82   : > { %s1685_s8 = sld [smem:[#allocation2 + %s1679_s15]] }
  0x83   : > { %s1688_s7 = sld [smem:[#allocation2 + %s1682_s24]] }
  0x84   : > { %s1697_s28 = sld [smem:[#allocation2 + %s1691_s14]] }
  0x85   : > { %s1700_s30 = sld [smem:[#allocation2 + %s1694_s25]] }
  0x86   : > { %s1725_s29 = sld [smem:[#allocation2 + %s478_s10]]  ;;  %s490_s10 = sadd.s32 23, %s1603_s16 }
  0x87   : > { %s1727_s6 = sld [smem:[#allocation2 + %s480_s18]]  ;;  %s492_s18 = sadd.s32 24, %s1603_s16 }
  0x88   : > { %2164 = sst [smem:[#allocation39_spill]] %s1685_s8 }
  0x89   : > { %2165 = sst [smem:[#allocation40_spill]] %s1688_s7 }
  0x8a   : > { %2166 = sst [smem:[#allocation41_spill]] %s1697_s28 }
  0x8b   : > { %2167 = sst [smem:[#allocation42_spill]] %s1700_s30 }
  0x8c   : > { %s1709_s7 = sld [smem:[#allocation2 + %s1703_s3]] }
  0x8d   : > { %s1712_s8 = sld [smem:[#allocation2 + %s1706_s2]] }
  0x8e   : > { %s1719_s28 = sld [smem:[#allocation2 + %s1715_s13]] }
  0x8f   : > { %s1721_s30 = sld [smem:[#allocation2 + %s476_s19]]  ;;  %s488_s19 = sadd.s32 22, %s1603_s16 }
  0x90   : > { %2172 = sst [smem:[#allocation47_spill]] %s1725_s29 }
  0x91   : > { %2173 = sst [smem:[#allocation48_spill]] %s1727_s6 }
  0x92   : > { %2168 = sst [smem:[#allocation43_spill]] %s1709_s7  ;;  %s482_s7 = sadd.s32 19, %s1603_s16 }
  0x93   : > { %2169 = sst [smem:[#allocation44_spill]] %s1712_s8  ;;  %s484_s8 = sadd.s32 20, %s1603_s16 }
  0x94   : > { %2170 = sst [smem:[#allocation45_spill]] %s1719_s28 }
  0x95   : > { %2171 = sst [smem:[#allocation46_spill]] %s1721_s30 }
  0x96   : > { %s1731_s17 = sld [smem:[#allocation2 + %s482_s7]]  ;;  %s494_s7 = sadd.s32 25, %s1603_s16 }
  0x97   : > { %s1733_s9 = sld [smem:[#allocation2 + %s484_s8]]  ;;  %s496_s8 = sadd.s32 26, %s1603_s16 }
  0x98   : > { %s1737_s28 = sld [smem:[#allocation2 + %s486_s26]] }
  0x99   : > { %s1739_s30 = sld [smem:[#allocation2 + %s488_s19]]  ;;  %s498_s19 = sadd.s32 27, %s1603_s16 }
  0x9a   : > { %s1743_s6 = sld [smem:[#allocation2 + %s490_s10]] }
  0x9b   : > { %s1745_s29 = sld [smem:[#allocation2 + %s492_s18]]  ;;  %s502_s18 = sadd.s32 29, %s1603_s16 }
  0x9c   : > { %s1751_s26 = sld [smem:[#allocation2 + %s496_s8]] }
  0x9d   : > { %2174 = sst [smem:[#allocation49_spill]] %s1733_s9 }
  0x9e   : > { %2175 = sst [smem:[#allocation50_spill]] %s1737_s28 }
  0x9f   : > { %2176 = sst [smem:[#allocation51_spill]] %s1739_s30  ;;  %s500_s30 = sadd.s32 28, %s1603_s16 }
  0xa0   : > { %2177 = sst [smem:[#allocation52_spill]] %s1743_s6 }
  0xa1   : > { %2178 = sst [smem:[#allocation53_spill]] %s1745_s29  ;;  %s504_s29 = sadd.s32 30, %s1603_s16 }
  0xa2   : > { %s1749_s9 = sld [smem:[#allocation2 + %s494_s7]] }
  0xa3   : > { %2180 = sst [smem:[#allocation55_spill]] %s1751_s26  ;;  %s506_s26 = sadd.s32 31, %s1603_s16 }
  0xa4   : > { %s1755_s28 = sld [smem:[#allocation2 + %s498_s19]] }
  0xa5   : > { %s1757_s10 = sld [smem:[#allocation2 + %s500_s30]] }
  0xa6   : > { %s1761_s7 = sld [smem:[#allocation2 + %s502_s18]] }
  0xa7   : > { %s1763_s8 = sld [smem:[#allocation2 + %s504_s29]] }
  0xa8   : > { %2179 = sst [smem:[#allocation54_spill]] %s1749_s9 }
  0xa9   : > { %s1767_s9 = sld [smem:[#allocation5 + %s1603_s16]] }
  0xaa   : > { %2181 = sst [smem:[#allocation56_spill]] %s1755_s28 }
  0xab   : > { %2182 = sst [smem:[#allocation57_spill]] %s1757_s10 }
  0xac   : > { %2183 = sst [smem:[#allocation58_spill]] %s1761_s7 }
  0xad   : > { %2184 = sst [smem:[#allocation59_spill]] %s1763_s8 }
  0xae   : > { %s1769_s19 = sld [smem:[#allocation2 + %s506_s26]] }
  0xaf   : > { %s1772_s30 = sld [smem:[#allocation5 + %s1631_s20]] }
  0xb0   : > { %s1775_s10 = sld [smem:[#allocation5 + %s1634_s4]] }
  0xb1   : > { %s1778_s18 = sld [smem:[#allocation5 + %s1643_s22]] }
  0xb2   : > { %s1781_s29 = sld [smem:[#allocation5 + %s1646_s11]] }
  0xb3   : > { %s1784_s8 = sld [smem:[#allocation5 + %s1655_s5]] }
  0xb4   : > { %2185 = sst [smem:[#allocation60_spill]] %s1769_s19 }
  0xb5   : > { %2186 = sst [smem:[#allocation61_spill]] %s1772_s30 }
  0xb6   : > { %2187 = sst [smem:[#allocation62_spill]] %s1775_s10 }
  0xb7   : > { %2188 = sst [smem:[#allocation63_spill]] %s1778_s18 }
  0xb8   : > { %2189 = sst [smem:[#allocation64_spill]] %s1781_s29 }
  0xb9   : > { %2190 = sst [smem:[#allocation65_spill]] %s1784_s8 }
  0xba   : > { %s1787_s7 = sld [smem:[#allocation5 + %s1658_s23]] }
  0xbb   : > { %s1790_s26 = sld [smem:[#allocation5 + %s1667_s0]] }
  0xbc   : > { %s1793_s19 = sld [smem:[#allocation5 + %s1670_s1]] }
  0xbd   : > { %s1796_s28 = sld [smem:[#allocation5 + %s1679_s15]] }
  0xbe   : > { %s1799_s6 = sld [smem:[#allocation5 + %s1682_s24]] }
  0xbf   : > { %s1802_s29 = sld [smem:[#allocation5 + %s1691_s14]] }
  0xc0   : > { %2191 = sst [smem:[#allocation66_spill]] %s1787_s7 }
  0xc1   : > { %2192 = sst [smem:[#allocation67_spill]] %s1790_s26 }
  0xc2   : > { %2193 = sst [smem:[#allocation68_spill]] %s1793_s19 }
  0xc3   : > { %2194 = sst [smem:[#allocation69_spill]] %s1796_s28 }
  0xc4   : > { %2195 = sst [smem:[#allocation70_spill]] %s1799_s6 }
  0xc5   : > { %2196 = sst [smem:[#allocation71_spill]] %s1802_s29 }
  0xc6   : > { %s1805_s8 = sld [smem:[#allocation5 + %s1694_s25]] }
  0xc7   : > { %s1808_s7 = sld [smem:[#allocation5 + %s1703_s3]] }
  0xc8   : > { %s1811_s26 = sld [smem:[#allocation5 + %s1706_s2]] }
  0xc9   : > { %s1814_s19 = sld [smem:[#allocation5 + %s1715_s13]] }
  0xca   : > { %s1817_s28 = sld [smem:[#allocation7 + %s1603_s16]] }
  0xcb   : > { %s1820_s6 = sld [smem:[#allocation7 + %s1631_s20]] }
  0xcc   : > { %2197 = sst [smem:[#allocation72_spill]] %s1805_s8 }
  0xcd   : > { %2198 = sst [smem:[#allocation73_spill]] %s1808_s7 }
  0xce   : > { %2199 = sst [smem:[#allocation74_spill]] %s1811_s26 }
  0xcf   : > { %2200 = sst [smem:[#allocation75_spill]] %s1814_s19 }
  0xd0   : > { %s1823_s18 = sld [smem:[#allocation7 + %s1634_s4]] }
  0xd1   : > { %s1826_s29 = sld [smem:[#allocation7 + %s1643_s22]] }
  0xd2   : > { %s1829_s8 = sld [smem:[#allocation7 + %s1646_s11]] }
  0xd3   : > { %s1832_s10 = sld [smem:[#allocation7 + %s1655_s5]] }
  0xd4   : > { %s1835_s7 = sld [smem:[#allocation7 + %s1658_s23]] }
  0xd5   : > { %s1838_s26 = sld [smem:[#allocation7 + %s1667_s0]] }
  0xd6   : > { %s1841_s30 = sld [smem:[#allocation7 + %s1670_s1]] }
  0xd7   : > { %s1844_s19 = sld [smem:[#allocation7 + %s1679_s15]] }
  0xd8   : > { %s1847_s16 = sld [smem:[#allocation7 + %s1682_s24]] }
  0xd9   : > { %s1850_s20 = sld [smem:[#allocation7 + %s1691_s14]] }
  0xda   : > { %2201 = sst [smem:[#allocation76_spill]] %s1835_s7  ;;  %s1865_s7 = smov 0  }
  0xdb   : > { %s1853_s4 = sld [smem:[#allocation7 + %s1694_s25]] }
  0xdc   : > { %s1856_s22 = sld [smem:[#allocation7 + %s1703_s3]] }
  0xdd   : > { %s1859_s11 = sld [smem:[#allocation7 + %s1706_s2]] }
  0xde   : > { %s1862_s5 = sld [smem:[#allocation7 + %s1715_s13]] }
  0xdf   : > { %2202 = sst [smem:[#allocation77_spill]] %s1850_s20 }
  0xe1   : > { %2203 = sst [smem:[#allocation78_spill]] %s1853_s4 }
  0xe2   : > { %2204 = sst [smem:[#allocation79_spill]] %s1856_s22 }
  0xe3   : > { %2205 = sst [smem:[#allocation80_spill]] %s1859_s11 }
  0xe4   : > { %2206 = sst [smem:[#allocation81_spill]] %s1862_s5 }
  0xe5 LB: >> { %s2207_s27 = sld [smem:[#allocation15_spill]]  ;;  %s2208_s21 = sld [smem:[#allocation26_spill]]  ;;  %v1428_v0 = vmov 0.0|0.0   ;;  %vm1429_vm0 = vmmov 0   ;;  %v1430_v1 = vmov 0.0   ;;  %vm553_vm1 = vcmask 130048   ;;  %s1423_s7 = sphi %s1865_s7, %s545_s7  }
  0xe6   : >> { %s2209_s0 = sld [smem:[#allocation28_spill]]  ;;  %2210 = sst [smem:[#allocation82_spill]] %s1423_s7  ;;  %1146 = vmatprep.subr.bf16.mxu0 %v1428_v0  ;;  %1138 = vmatprep.mubr.msk.f32.mxu0 %vm1429_vm0, %v1430_v1  ;;  %v664_v11 = vstv %s1731_s17  ;;  %v634_v20 = vstv %s1767_s9  ;;  %v637_v36 = vstv %s1817_s28  ;;  %v648_v37 = vstv %s1820_s6 }
  0xe7   : >> { %s2211_s2 = sld [smem:[#allocation29_spill]]  ;;  %s2212_s24 = sld [smem:[#allocation46_spill]]  ;;  %1141 = vmatprep.subr.mxu1 %v1430_v1  ;;  %1143 = vmatprep.mubr.msk.f32.mxu1 %vm1429_vm0, %v1430_v1  ;;  %v659_v40 = vstv %s1823_s18  ;;  %v670_v41 = vstv %s1826_s29  ;;  %v681_v44 = vstv %s1829_s8  ;;  %v692_v48 = vstv %s1832_s10 }
  0xe8   : >> { %s2213_s25 = sld [smem:[#allocation47_spill]]  ;;  %s2214_s14 = sld [smem:[#allocation48_spill]]  ;;  %v714_v50 = vstv %s1838_s26  ;;  %vm805_vm2 = vcmask 64512  }
  0xe9   : >> { %s2215_s15 = sld [smem:[#allocation30_spill]]  ;;  %s1875_s13 = sshll.u32 %s1423_s7, 3 }
  0xea   : >> { %s2216_s23 = sld [smem:[#allocation31_spill]]  ;;  %s2217_s12 = sld [smem:[#allocation32_spill]] }
  0xeb   : >> { %s2110_s1 = sshll.u32 %s2207_s27, 4  ;;  %s2219_s27 = sld [smem:[#allocation34_spill]] }
  0xec   : >> { %s550_s3 = scalar_lea.vmem %s2208_s21, %s2110_s1  ;;  %s547_s1 = scalar_lea.vmem %s2209_s0, %s1875_s13 }
  0xed   : >> { %v551_v2 = vld [vmem:[%s550_s3] sm:$0xff]  ;;  %v552_v3 = vld [vmem:[%s550_s3 + $0x8] sm:$0xff]  ;;  %s2218_s21 = sld [smem:[#allocation33_spill]]  ;;  %s627_s3 = scalar_lea.vmem %s2211_s2, %s1875_s13  ;;  %v631_v7 = vstv %s2212_s24 }
  0xee   : >> { %v1147_v4 = vpack.c.bf16 %v552_v3, %v551_v2  ;;  %v548_v5 = vld [vmem:[%s547_s1] sm:$0xff]  ;;  %s2220_s5 = sld [smem:[#allocation49_spill]]  ;;  %s2221_s7 = sld [smem:[#allocation35_spill]]  ;;  %v642_v8 = vstv %s2213_s25  ;;  %v653_v9 = vstv %s2214_s14 }
  0xef   : >> { %v1882_v6 = vld [vmem:[%s627_s3] sm:$0xff]  ;;  %s2222_s11 = sld [smem:[#allocation50_spill]]  ;;  %s2223_s22 = sld [smem:[#allocation61_spill]]  ;;  %v629_v10 = vstv %s2215_s15 }
  0xf0   : >> { %1148 = vmatpush3.bf16.msra.mxu0 %v1147_v4  ;;  %s2224_s4 = sld [smem:[#allocation62_spill]]  ;;  %s2225_s0 = sld [smem:[#allocation63_spill]]  ;;  %v632_v12 = vmul.f32 %v631_v7, %v1882_v6  ;;  %v640_v13 = vstv %s2216_s23  ;;  %v643_v14 = vmul.f32 %v642_v8, %v1882_v6  ;;  %v651_v15 = vstv %s2217_s12 }
  0xf1   : >> { %s2226_s1 = sld [smem:[#allocation51_spill]]  ;;  %s2227_s20 = sld [smem:[#allocation64_spill]]  ;;  %v654_v16 = vmul.f32 %v653_v9, %v1882_v6  ;;  %v673_v18 = vstv %s2219_s27  ;;  %v665_v21 = vmul.f32 %v664_v11, %v1882_v6 }
  0xf2   : >> { %s2228_s2 = sld [smem:[#allocation65_spill]]  ;;  %s2229_s3 = sld [smem:[#allocation36_spill]] }
  0xf3   : >> { %1139 = vmatmul.mubr.msk.f32.vlgmr.msra.gmra.mrb[0].mxu0 %vm553_vm1, %v548_v5  ;;  %v662_v17 = vstv %s2218_s21  ;;  %s2230_s24 = sld [smem:[#allocation66_spill]]  ;;  %s2231_s25 = sld [smem:[#allocation37_spill]] }
  0xf4   : >> { %v675_v19 = vstv %s2220_s5  ;;  %s2232_s14 = sld [smem:[#allocation52_spill]]  ;;  %v684_v22 = vstv %s2221_s7  ;;  %s2233_s23 = sld [smem:[#allocation67_spill]] }
  0xf5   : >> { %v686_v23 = vstv %s2222_s11  ;;  %v645_v24 = vstv %s2223_s22  ;;  %s2234_s12 = sld [smem:[#allocation53_spill]]  ;;  %s2235_s27 = sld [smem:[#allocation54_spill]]  ;;  %v676_v28 = vmul.f32 %v675_v19, %v1882_v6 }
  0xf6   : >> { %v656_v25 = vstv %s2224_s4  ;;  %v667_v26 = vstv %s2225_s0  ;;  %s2236_s21 = sld [smem:[#allocation55_spill]]  ;;  %s2237_s5 = sld [smem:[#allocation56_spill]]  ;;  %v687_v32 = vmul.f32 %v686_v23, %v1882_v6 }
  0xf7   : >> { %v697_v27 = vstv %s2226_s1  ;;  %v678_v29 = vstv %s2227_s20  ;;  %s2238_s7 = sld [smem:[#allocation76_spill]]  ;;  %s2240_s4 = sld [smem:[#allocation38_spill]] }
  0xf8   : >> { %v689_v30 = vstv %s2228_s2  ;;  %v695_v31 = vstv %s2229_s3  ;;  %s2241_s11 = sld [smem:[#allocation39_spill]]  ;;  %v698_v38 = vmul.f32 %v697_v27, %v1882_v6  ;;  %s2242_s20 = sld [smem:[#allocation40_spill]] }
  0xf9   : >> { %v700_v33 = vstv %s2230_s24  ;;  %v706_v34 = vstv %s2231_s25  ;;  %s2243_s15 = sld [smem:[#allocation41_spill]]  ;;  %s2244_s0 = sld [smem:[#allocation42_spill]] }
  0xfa   : >> { %v708_v35 = vstv %s2232_s14  ;;  %v711_v39 = vstv %s2233_s23  ;;  %s2245_s1 = sld [smem:[#allocation57_spill]]  ;;  %s2246_s2 = sld [smem:[#allocation43_spill]] }
  0xfb   : >> { %v719_v42 = vstv %s2234_s12  ;;  %v730_v43 = vstv %s2235_s27  ;;  %v709_v45 = vmul.f32 %v708_v35, %v1882_v6  ;;  %s2247_s3 = sld [smem:[#allocation68_spill]]  ;;  %s2248_s25 = sld [smem:[#allocation58_spill]] }
  0xfc   : >> { %v741_v46 = vstv %s2236_s21  ;;  %v752_v47 = vstv %s2237_s5  ;;  %v720_v52 = vmul.f32 %v719_v42, %v1882_v6  ;;  %v731_v54 = vmul.f32 %v730_v43, %v1882_v6  ;;  %s2249_s14 = sld [smem:[#allocation69_spill]]  ;;  %s2250_s12 = sld [smem:[#allocation70_spill]] }
  0xfd   : >> { %v703_v49 = vstv %s2238_s7  ;;  %v717_v51 = vstv %s2240_s4  ;;  %v1936_v57 = vmul.f32 %v741_v46, %v1882_v6  ;;  %v1940_v59 = vmul.f32 %v752_v47, %v1882_v6  ;;  %s2251_s27 = sld [smem:[#allocation71_spill]]  ;;  %s2252_s21 = sld [smem:[#allocation72_spill]] }
  0xfe   : >> { %v728_v53 = vstv %s2241_s11  ;;  %v739_v55 = vstv %s2242_s20  ;;  %s2253_s5 = sld [smem:[#allocation44_spill]]  ;;  %s2254_s7 = sld [smem:[#allocation59_spill]] }
  0xff   : >> { %v750_v58 = vstv %s2243_s15  ;;  %v761_v60 = vstv %s2244_s0  ;;  %s2255_s4 = sld [smem:[#allocation73_spill]]  ;;  %s2256_s11 = sld [smem:[#allocation60_spill]] }
 0x100   : >> { %v763_v5 = vstv %s2245_s1  ;;  %v772_v19 = vstv %s2246_s2  ;;  %s2257_s20 = sld [smem:[#allocation45_spill]]  ;;  %s2258_s15 = sld [smem:[#allocation74_spill]] }
 0x101   : >> { %v722_v35 = vstv %s2247_s3  ;;  %s2259_s0 = sld [smem:[#allocation77_spill]]  ;;  %s2260_s1 = sld [smem:[#allocation75_spill]] }
 0x102   : >> { %s2261_s2 = sld [smem:[#allocation78_spill]]  ;;  %s2262_s3 = sld [smem:[#allocation79_spill]] }
 0x103   : >> { %v755_v43 = vstv %s2251_s27  ;;  %v766_v47 = vstv %s2252_s21  ;;  %s2266_s27 = sld [smem:[#allocation27_spill]]  ;;  %s2267_s21 = sld [smem:[#allocation25_spill]] }
 0x1c6   : >> { %v1933_v56 = vpop.f32.mrb[0].mxu0 }
 0x1c7   : >> { %v1140_v61 = vpop.f32.mrb[1].mxu0  ;;  %v630_v62 = vmul.f32 %v629_v10, %v1933_v56  ;;  %v641_v63 = vmul.f32 %v640_v13, %v1933_v56  ;;  %v652_v0 = vmul.f32 %v651_v15, %v1933_v56  ;;  %v663_v1 = vmul.f32 %v662_v17, %v1933_v56 }
 0x1c8   : >> { %v674_v2 = vmul.f32 %v673_v18, %v1933_v56  ;;  %v685_v3 = vmul.f32 %v684_v22, %v1933_v56  ;;  %v696_v4 = vmul.f32 %v695_v31, %v1933_v56  ;;  %v707_v15 = vmul.f32 %v706_v34, %v1933_v56 }
 0x1c9   : >> { %v633_v7 = vadd.f32 %v632_v12, %v630_v62  ;;  %v644_v8 = vadd.f32 %v643_v14, %v641_v63  ;;  %v655_v9 = vadd.f32 %v654_v16, %v652_v0  ;;  %v666_v11 = vadd.f32 %v665_v21, %v663_v1 }
 0x1ca   : >> { %v677_v10 = vadd.f32 %v676_v28, %v674_v2  ;;  %v688_v13 = vadd.f32 %v687_v32, %v685_v3  ;;  %v699_v31 = vadd.f32 %v698_v38, %v696_v4  ;;  %v774_v12 = vstv %s2248_s25  ;;  %s2263_s25 = sld [smem:[#allocation80_spill]] }
 0x1cb   : >> { %v635_v17 = vadd.f32 %v634_v20, %v633_v7  ;;  %v646_v18 = vadd.f32 %v645_v24, %v644_v8  ;;  %v657_v23 = vadd.f32 %v656_v25, %v655_v9  ;;  %v668_v22 = vadd.f32 %v667_v26, %v666_v11 }
 0x1cc   : >> { %v679_v27 = vadd.f32 %v678_v29, %v677_v10  ;;  %v733_v28 = vstv %s2249_s14  ;;  %v690_v34 = vadd.f32 %v689_v30, %v688_v13  ;;  %v710_v42 = vadd.f32 %v709_v45, %v707_v15  ;;  %s2264_s14 = sld [smem:[#allocation81_spill]] }
 0x1cd   : >> { %v636_v14 = vmax.f32 %v635_v17, 0.0  ;;  %v647_v16 = vmax.f32 %v646_v18, 0.0  ;;  %v658_v21 = vmax.f32 %v657_v23, 0.0  ;;  %v669_v32 = vmax.f32 %v668_v22, 0.0 }
 0x1ce   : >> { %v744_v20 = vstv %s2250_s12  ;;  %v764_v26 = vmul.f32 %v763_v5, %v1882_v6  ;;  %v680_v38 = vmax.f32 %v679_v27, 0.0  ;;  %v701_v46 = vadd.f32 %v700_v33, %v699_v31  ;;  %s2265_s12 = sld [smem:[#allocation15_spill]] }
 0x1cf   : >> { %v638_v24 = vmul.f32 %v637_v36, %v636_v14  ;;  %v649_v25 = vmul.f32 %v648_v37, %v647_v16  ;;  %v660_v29 = vmul.f32 %v659_v40, %v658_v21  ;;  %v718_v62 = vmul.f32 %v717_v51, %v1933_v56 }
 0x1d0   : >> { %v729_v30 = vmul.f32 %v728_v53, %v1933_v56  ;;  %v740_v45 = vmul.f32 %v739_v55, %v1933_v56  ;;  %v671_v36 = vmul.f32 %v670_v41, %v669_v32  ;;  %v691_v37 = vmax.f32 %v690_v34, 0.0 }
 0x1d1   : >> { %v650_v61 = vadd.f32 %v649_v25, %v638_v24  ;;  %v712_v63 = vadd.f32 %v711_v39, %v710_v42  ;;  %v775_v40 = vmul.f32 %v774_v12, %v1882_v6  ;;  %v721_v0 = vadd.f32 %v720_v52, %v718_v62 }
 0x1d2   : >> { %v732_v1 = vadd.f32 %v731_v54, %v729_v30  ;;  %v751_v2 = vmul.f32 %v750_v58, %v1933_v56  ;;  %v682_v51 = vmul.f32 %v681_v44, %v680_v38  ;;  %v702_v53 = vmax.f32 %v701_v46, 0.0 }
 0x1d3   : >> { %v661_v33 = vadd.f32 %v660_v29, %v650_v61  ;;  %v783_v55 = vstv %s2253_s5  ;;  %v785_v3 = vstv %s2254_s7  ;;  %v723_v4 = vadd.f32 %v722_v35, %v721_v0 }
 0x1d4   : >> { %v743_v39 = vadd.f32 %v1936_v57, %v740_v45  ;;  %v762_v5 = vmul.f32 %v761_v60, %v1933_v56  ;;  %v713_v7 = vmax.f32 %v712_v63, 0.0  ;;  %v773_v52 = vmul.f32 %v772_v19, %v1933_v56  ;;  %s1118_s5 = sshll.u32 %s2265_s12, 3 }
 0x1d5   : >> { %v672_v41 = vadd.f32 %v671_v36, %v661_v33  ;;  %v777_v54 = vstv %s2255_s4  ;;  %v796_v58 = vstv %s2256_s11  ;;  %v693_v44 = vmul.f32 %v692_v48, %v691_v37  ;;  %s818_s7 = scalar_lea.vmem %s2266_s27, %s1118_s5  ;;  %s2268_s4 = sshll.u32 %s2265_s12, 4 }
 0x1d6   : >> { %v734_v9 = vadd.f32 %v733_v28, %v732_v1  ;;  %v754_v11 = vadd.f32 %v1940_v59, %v751_v2  ;;  %v704_v10 = vmul.f32 %v703_v49, %v702_v53  ;;  %v784_v57 = vmul.f32 %v783_v55, %v1933_v56  ;;  %s893_s11 = sadd.s32 %s2268_s4, %s1875_s13 }
 0x1d7   : >> { %v683_v8 = vadd.f32 %v682_v51, %v672_v41  ;;  %v786_v60 = vmul.f32 %v785_v3, %v1882_v6  ;;  %v794_v13 = vstv %s2257_s20  ;;  %v724_v17 = vmax.f32 %v723_v4, 0.0  ;;  %s2269_s20 = scalar_lea.vmem [#allocation8], %s2267_s21 }
 0x1d8   : >> { %v745_v19 = vadd.f32 %v744_v20, %v743_v39  ;;  %v765_v18 = vadd.f32 %v764_v26, %v762_v5  ;;  %v715_v23 = vmul.f32 %v714_v50, %v713_v7  ;;  %v725_v48 = vstv %s1841_s30 }
 0x1d9   : >> { %v694_v15 = vadd.f32 %v693_v44, %v683_v8  ;;  %v776_v22 = vadd.f32 %v775_v40, %v773_v52  ;;  %v797_v59 = vmul.f32 %v796_v58, %v1882_v6  ;;  %v735_v49 = vmax.f32 %v734_v9, 0.0  ;;  %v819_v8 = vld [vmem:[%s818_s7] sm:$0xff] }
 0x1da   : >> { %v756_v31 = vadd.f32 %v755_v43, %v754_v11  ;;  %v795_v35 = vmul.f32 %v794_v13, %v1933_v56  ;;  %v736_v12 = vstv %s1844_s19  ;;  %v787_v14 = vadd.f32 %v786_v60, %v784_v57  ;;  %1142 = vmatpush3.msra.mxu1 %v819_v8 }
 0x1db   : >> { %v705_v27 = vadd.f32 %v704_v10, %v694_v15  ;;  %v726_v21 = vmul.f32 %v725_v48, %v724_v17  ;;  %v746_v28 = vmax.f32 %v745_v19, 0.0  ;;  %v767_v32 = vadd.f32 %v766_v47, %v765_v18 }
 0x1dc   : >> { %v747_v50 = vstv %s1847_s16  ;;  %v778_v34 = vadd.f32 %v777_v54, %v776_v22  ;;  %v788_v42 = vstv %s2258_s15  ;;  %v737_v6 = vmul.f32 %v736_v12, %v735_v49  ;;  %s894_s15 = scalar_lea.vmem %s2269_s20, %s893_s11 [#allocation8] }
 0x1dd   : >> { %v716_v16 = vadd.f32 %v715_v23, %v705_v27  ;;  %v757_v24 = vmax.f32 %v756_v31, 0.0  ;;  %v798_v25 = vadd.f32 %v797_v59, %v795_v35  ;;  %v758_v43 = vstv %s2259_s0  ;;  %s2270_s0 = sld [smem:[#allocation82_spill]] }
 0x1de   : >> { %v799_v26 = vstv %s2260_s1  ;;  %v748_v56 = vmul.f32 %v747_v50, %v746_v28  ;;  %v768_v38 = vmax.f32 %v767_v32, 0.0  ;;  %v789_v46 = vadd.f32 %v788_v42, %v787_v14 }
 0x1df   : >> { %v727_v20 = vadd.f32 %v726_v21, %v716_v16  ;;  %v769_v61 = vstv %s2261_s2  ;;  %v759_v30 = vmul.f32 %v758_v43, %v757_v24  ;;  %v779_v47 = vmax.f32 %v778_v34, 0.0 }
 0x1e0   : >> { %v800_v45 = vadd.f32 %v799_v26, %v798_v25  ;;  %v780_v36 = vstv %s2262_s3  ;;  %v770_v63 = vmul.f32 %v769_v61, %v768_v38  ;;  %v790_v40 = vmax.f32 %v789_v46, 0.0 }
 0x1e1   : >> { %v738_v29 = vadd.f32 %v737_v6, %v727_v20  ;;  %v791_v33 = vstv %s2263_s25  ;;  %v781_v1 = vmul.f32 %v780_v36, %v779_v47  ;;  %v802_v51 = vstv %s2264_s14 }
 0x1e2   : >> { %v801_v2 = vmax.f32 %v800_v45, 0.0  ;;  %v792_v55 = vmul.f32 %v791_v33, %v790_v40 }
 0x1e3   : >> { %v749_v62 = vadd.f32 %v748_v56, %v738_v29  ;;  %s545_s7 = sadd.s32 1, %s2270_s0  }
 0x1e4   : >> { %v803_v41 = vmul.f32 %v802_v51, %v801_v2  ;;  %p542_p10 = scmp.ge.s32.totalorder %s545_s7, 2  }
 0x1e5   : >> { %v760_v37 = vadd.f32 %v759_v30, %v749_v62  ;;  %s2271_s1 = sld [smem:[#allocation16_spill]] (%p542_p10)  ;;  %s2272_s2 = sld [smem:[#allocation25_spill]] (%p542_p10) }
 0x1e6   : > { %s2273_s3 = sld [smem:[#allocation13_spill]] (%p542_p10)  ;;  %s2274_s25 = sld [smem:[#allocation21_spill]] (%p542_p10) }
 0x1e7   : >> { %v771_v0 = vadd.f32 %v770_v63, %v760_v37  ;;  %s2275_s13 = sld [smem:[#allocation90_spill]] (%p542_p10)  ;;  %s1431_s9 = smov (%p542_p10), [#allocation8]  }
 0x1e8   : > { %s1317_s17 = sshll.u32 (%p542_p10), %s1431_s9, 4  ;;  %s1318_s17 = int_to_ptr.vmem [resolvable:$false] %s1317_s17 }
 0x1e9   : >> { %v782_v53 = vadd.f32 %v781_v1, %v771_v0  ;;  %s1319_s6 = scalar_lea.vmem (%p542_p10), %s1318_s17, 2048 }
 0x1eb   : >> { %v793_v3 = vadd.f32 %v792_v55, %v782_v53  ;;  %s1128_s14 = sshll.u32 (%p542_p10), %s2271_s1, 10  ;;  %s2276_s5 = scalar_lea.vmem (%p542_p10), [#allocation8], %s2272_s2 }
 0x1ec   : > { %s912_s4 = sshll.u32 (%p542_p10), %s2276_s5, 4  ;;  %s2277_s11 = sand.u32 (%p542_p10), 1, %s2273_s3   ;;  %s2024_s4 = int_to_ptr.vmem [resolvable:$true] %s912_s4 }
 0x1ed   : >> { %v804_v4 = vadd.f32 %v803_v41, %v793_v3  ;;  %s2020_s21 = scalar_lea.hbm (%p542_p10), %s2275_s13, %s1128_s14  ;;  %s2028_s7 = scalar_lea.sflag (%p542_p10), [#allocation3], %s2277_s11 }
 0x1ee   : > { %s1313_s28 = scalar_lea.vmem (%p542_p10), %s2024_s4, 1024  ;;  %p2278_p0 = scmp.ne.s32.totalorder (%p542_p10), %s2274_s25, 0 }
 0x1ef   : >> { %v806_v39 = vsel %vm805_vm2, %v804_v4, -inf  ;;  %p1314_p13 = scmp.ne.s32.totalorder (%p542_p10), %s2024_s4, %s1313_s28  ;;  %p1320_p7 = scmp.lt.s32.totalorder (%p542_p10), %s2024_s4, %s1318_s17 }
 0x1f0   : >> { %807 = vmax.xlane.f32.xlu0 %v806_v39  ;;  %p1321_p8 = scmp.lt.s32.totalorder (%p542_p10), %s1319_s6, %s1313_s28 }
 0x1f1   : > { %p1315_p2 = pnand (%p542_p10), %p1314_p13, %p2278_p0 }
 0x1f2   : > { %p1322_p11 = por (%p542_p10), %p1321_p8, %p1320_p7 }
 0x1f3   : > { %p1316_p6 = pneg (%p542_p10), %p1315_p2 }
 0x1f5   : > { %p1323_p12 = pnand (%p542_p10), %p1322_p11, %p1316_p6 }
 0x27d   : >> { %v808_v5 = vpop.xlane.xlu0 %807 }
 0x27e   : >> { %v809_v7 = vsub.f32 %v804_v4, %v808_v5 }
 0x280   : >> { %v810_v52 = vmul.f32 1.442695, %v809_v7 }
 0x282   : >> { %1264 = vpow2.f32 %v810_v52 }
 0x28c   : >> { %v1265_v54 = vpop.eup %1264 }
 0x28d   : >> { %v812_v58 = vsel %vm805_vm2, %v1265_v54, 0.0 }
 0x28e   : >> { %813 = vadd.xlane.f32.xlu0 %v812_v58 }
 0x31b   : >> { %v814_v44 = vpop.xlane.xlu0 %813 }
 0x31c   : >> { %1266 = vrcp.f32 %v814_v44 }
 0x326   : >> { %v1267_v9 = vpop.eup %1266 }
 0x327   : >> { %v816_v11 = vmul.f32 %v1267_v9, %v1265_v54 }
 0x329   : >> { %1144 = vmatmul.mubr.msk.f32.vlgmr.msra.gmra.mrb[0].mxu1 %vm805_vm2, %v816_v11 }
 0x3f7   : > { %544 = sbr.rel (!%p542_p10) target bundleno = 229 (0xe5), region = 117 }
 0x3fc   : >> { %v889_v10 = vpop.f32.mrb[0].mxu1 }
 0x3fd   : >> { %895 = vst.msk [vmem:[%s894_s15] sm:$0xff] %vm553_vm1, %v889_v10  ;;  %v1145_v57 = vpop.f32.mrb[1].mxu1 }
 0x3fe   : > { %1326 = shalt.err (!%p1323_p12)
}
 0x3ff   : > { %s1327_s10 = scalar_lea.hbm %s2020_s21, 1024  ;;  %s1331_s30 = scalar_lea.hbm %s2275_s13, 2048 }
 0x400   : > { %p1328_p1 = scmp.ne.s32.totalorder %s2020_s21, %s1327_s10  ;;  %p1332_p3 = scmp.lt.u32.totalorder %s2020_s21, %s2275_s13 }
 0x401   : > { %p1333_p9 = scmp.lt.u32.totalorder %s1331_s30, %s1327_s10  ;;  %p1335_p13 = scmp.lt.u32.totalorder %s1327_s10, %s2020_s21 }
 0x402   : > { %p1329_p4 = pnand %p1328_p1, %p2278_p0 }
 0x403   : > { %p1334_p10 = por %p1333_p9, %p1332_p3 }
 0x404   : > { %p1330_p5 = pneg %p1329_p4 }
 0x405   : > { %p1336_p2 = por %p1335_p13, %p1334_p10 }
 0x407   : > { %p1337_p6 = pnand %p1336_p2, %p1330_p5 }
 0x409   : > { %1340 = shalt.err (!%p1337_p6)
}
 0x40a   : > { %s1432_s26 = smov 128   ;;  %s1433_s16 = smov 8  }
 0x40b   : > { %1161 = dma.vmem_to_hbm [thread:$0]  (%p2278_p0), %s2024_s4, 1024, %s2020_s21, %s2028_s7, %s1432_s26, %s1432_s26, %s1433_s16  }
 0x40c PF: > { %s2279_s24 = sld [smem:[#allocation19_spill]]  ;;  %s2280_s23 = sld [smem:[#allocation12_spill]] }
 0x40d   : > { %s2281_s22 = sld [smem:[#allocation23_spill]] }
 0x412   : > { %p1183_p7 = scmp.ge.s32.totalorder %s2279_s24, 2  ;;  %s927_s20 = sand.u32 1, %s2280_s23  }
 0x413   : > { %p2282_p8 = scmp.ne.s32.totalorder %s2281_s22, 0  ;;  %s928_s15 = scalar_lea.sflag [#allocation3], %s927_s20 }
 0x415   : > { %p1174_p11 = pnand %p1183_p7, %p2282_p8 }
 0x417   : > { %1386 = dma.done.wait (!%p1174_p11), %s928_s15, 1024  }
 0x418   : > { %1388 = vsyncadd (!%p1174_p11), %s928_s15, 4294966272  ;;  %s22_s8 = sadd.s32 1, %s2279_s24   ;;  %s2283_s24 = sld [smem:[#allocation13_spill]] }
 0x419   : > { %p19_p12 = scmp.ge.s32.totalorder %s22_s8, 10   ;;  %s2284_s25 = sld [smem:[#allocation14_spill]] }
 0x41a   : > { %s2285_s26 = sld [smem:[#allocation24_spill]]  ;;  %s2286_s27 = sld [smem:[#allocation17_spill]] }
 0x41b   : > { %s2287_s28 = sld [smem:[#allocation18_spill]]  ;;  %s2288_s29 = sld [smem:[#allocation20_spill]] }
 0x41c   : > { %s2289_s30 = sld [smem:[#allocation22_spill]]  ;;  %21 = sbr.rel (!%p19_p12) target bundleno = 16 (0x10), region = 128 }
 0x423   :  { %933 = vsyncpa [#allocation3], 1 }
 0x424   :  { %935 = vsyncpa [#allocation3 + $0x1], 1 }
 0x425   :  { %936 = vsyncpa [#allocation4], 1 }
 0x426   :  { %938 = vsyncpa [#allocation4 + $0x1], 1 }
 0x427   :  { %939 = vsyncpa [#allocation6], 1 }

</bundles_post_ra>
